<compile_context>
chip_gen: v6e
topology: v6e:2x2x1
jax: 0.10.0
libtpu: 0.0.40
codegen_flags: <defaults>
</compile_context>

<pallas_src>
import numpy as np
import jax
import jax.numpy as jnp
from jax.experimental import pallas as pl
from jax.experimental.pallas import tpu as pltpu

N_QUBITS = 4
KSIZE = 2
STRIDE = 2
DIM = 2 ** N_QUBITS          # 16
HIDDEN = 64
N_CLASSES = 10
NCLS_PAD = 16                # fc2 rows padded to a full sublane tile (sliced to 10 outside)


# ----------------------- parameter / circuit setup (numpy glue, runs once) ----

def _rx(t):
    c, s = np.cos(t / 2.0), np.sin(t / 2.0)
    return np.array([[c, -1j * s], [-1j * s, c]], dtype=np.complex128)


def _rz(t):
    return np.array([[np.exp(-1j * t / 2.0), 0.0],
                     [0.0, np.exp(1j * t / 2.0)]], dtype=np.complex128)


def _kron_all(mats):
    out = mats[0]
    for m in mats[1:]:
        out = np.kron(out, m)
    return out


def _cnot(n, ctrl, tgt):
    d = 2 ** n
    m = np.zeros((d, d), dtype=np.complex128)
    for b in range(d):
        cb = (b >> (n - 1 - ctrl)) & 1
        nb = b ^ (cb << (n - 1 - tgt))
        m[nb, b] = 1.0
    return m


def build_qconv_unitary(w):
    """Fixed (input-independent) 16x16 unitary of the parameterized circuit."""
    w = np.asarray(w, dtype=np.float64)
    gates = []
    for q in range(N_QUBITS):
        # circuit applies rx(w0), rz(w1), rx(w2) in order -> matrix Rx2 @ Rz1 @ Rx0
        gates.append(_rx(w[3 * q + 2]) @ _rz(w[3 * q + 1]) @ _rx(w[3 * q + 0]))
    u = _kron_all(gates)
    for q in range(N_QUBITS):                      # CNOT ring, circuit order
        u = _cnot(N_QUBITS, q, (q + 1) % N_QUBITS) @ u
    return u


def build_z_signs():
    """(16, 4): column q holds diag(Z_q) in the computational basis (qubit 0 = MSB)."""
    s = np.zeros((DIM, N_QUBITS), dtype=np.float32)
    for b in range(DIM):
        for q in range(N_QUBITS):
            s[b, q] = 1.0 - 2.0 * ((b >> (N_QUBITS - 1 - q)) & 1)
    return s


def build_pair_selectors():
    """Constant 0/1 selector matrices that let the MXU build the product state.

    sel_sc (16, 8): LR = sel_sc @ [s0..s3, c0..c3]^rows gives, per patch column,
        rows  0- 3 : left01[i]  = (bit0(i) ? s0 : c0)   (i indexes the qubit-01 pair)
        rows  4- 7 : left23[j]  = (bit2(j) ? s2 : c2)
        rows  8-11 : right01[i] = (bit1(i) ? s1 : c1)
        rows 12-15 : right23[j] = (bit3(j) ? s3 : c3)
    so p = LR[:8] * LR[8:] = [p01 ; p23] (pairwise amplitude products).

    sel_ab (32, 8): AB = sel_ab @ p gives AB[:16][b] = p01[b>>2], AB[16:][b] = p23[b&3],
    so psi = AB[:16] * AB[16:] is the 16-dim product-state amplitude vector.
    """
    sel_sc = np.zeros((DIM, 2 * N_QUBITS), dtype=np.float32)
    for i in range(4):
        b_hi, b_lo = i >> 1, i & 1
        sel_sc[i,      0 if b_hi else 4] = 1.0   # left01  -> qubit 0: s0 / c0
        sel_sc[4 + i,  2 if b_hi else 6] = 1.0   # left23  -> qubit 2: s2 / c2
        sel_sc[8 + i,  1 if b_lo else 5] = 1.0   # right01 -> qubit 1: s1 / c1
        sel_sc[12 + i, 3 if b_lo else 7] = 1.0   # right23 -> qubit 3: s3 / c3
    sel_ab = np.zeros((2 * DIM, 2 * N_QUBITS), dtype=np.float32)
    for b in range(DIM):
        sel_ab[b, b >> 2] = 1.0
        sel_ab[DIM + b, 4 + (b & 3)] = 1.0
    return sel_sc, sel_ab


# ----------------------------- Pallas kernels ---------------------------------

def quanv_kernel(x8_ref, selsc_ref, selab_ref, wri_ref, sgnT_ref, out_ref):
    """Feature-major quantum conv on one lane-dense tile.

    x8_ref:    (8, TM)   rows 0-3 = patch pixels x_q, rows 4-7 = 1 - x_q
    selsc_ref: (16, 8)   selector for pairwise products (resident constant)
    selab_ref: (32, 8)   selector for the full product state (resident constant)
    wri_ref:   (32, 16)  [Re(U); Im(U)] stacked -> one MXU issue for both parts
    sgnT_ref:  (4, 16)   sgnT[q, b] = <b|Z_q|b>
    out_ref:   (4, TM)   <Z_q> per patch

    NOTE: every op here is column-local; OOB lanes of a ragged tail tile hold
    garbage that is only discarded by the masked output write.  Do not add any
    cross-lane reduction over the TM axis.
    """
    # Single transcendental: rows 0-3 -> sin(pi*x/2), rows 4-7 -> sin(pi*(1-x)/2)
    # = cos(pi*x/2).  Exact for all x (no range assumption needed).
    sc = jnp.sin((0.5 * jnp.pi) * x8_ref[...])                               # (8, TM)
    # Row replication / basis-state selection on the MXU (idle slot), not the VPU.
    lr = jnp.dot(selsc_ref[...], sc, preferred_element_type=jnp.float32)     # (16, TM)
    p = lr[:8, :] * lr[8:, :]                                                # (8, TM) [p01;p23]
    ab = jnp.dot(selab_ref[...], p, preferred_element_type=jnp.float32)      # (32, TM)
    psi = ab[:DIM, :] * ab[DIM:, :]                                          # (16, TM) |psi1>
    # amplitudes of U|psi1>: real rows 0..15, imag rows 16..31.
    amps = jnp.dot(wri_ref[...], psi, preferred_element_type=jnp.float32)    # (32, TM)
    p_r = amps[:DIM, :]
    p_i = amps[DIM:, :]
    probs = p_r * p_r + p_i * p_i                                            # (16, TM)
    out_ref[...] = jnp.dot(sgnT_ref[...], probs, preferred_element_type=jnp.float32)


def mlp_kernel(xT_ref, w1_ref, b1_ref, w2_ref, b2_ref, out_ref):
    """Transposed MLP: batch on the lane axis, hidden/classes on sublanes."""
    h = jnp.dot(w1_ref[...], xT_ref[...], preferred_element_type=jnp.float32) + b1_ref[...]
    h = jnp.maximum(h, 0.0)
    out_ref[...] = jnp.dot(w2_ref[...], h, preferred_element_type=jnp.float32) + b2_ref[...]


# ----------------------------- wrappers ----------------------------------------

def quanv_pallas(x8, selsc, selab, wri, sgnT):
    P = x8.shape[1]
    # Big lane-dense tiles amortize the ~0.35us per-grid-step overhead (VMEM per
    # step is a few MiB at most); keep >=2 grid steps when possible so both v7x
    # TensorCores get work (neutral on v5e/v6e).
    TM = 8192
    if P < 2 * TM:
        TM = max(128, 128 * pl.cdiv(pl.cdiv(P, 2), 128))
    grid = (pl.cdiv(P, TM),)     # ragged tail: garbage stays lane-local, writes dropped
    return pl.pallas_call(
        quanv_kernel,
        out_shape=jax.ShapeDtypeStruct((N_QUBITS, P), jnp.float32),
        grid=grid,
        in_specs=[
            pl.BlockSpec((2 * N_QUBITS, TM), lambda i: (0, i)),
            pl.BlockSpec((DIM, 2 * N_QUBITS), lambda i: (0, 0)),     # resident constant
            pl.BlockSpec((2 * DIM, 2 * N_QUBITS), lambda i: (0, 0)), # resident constant
            pl.BlockSpec((2 * DIM, DIM), lambda i: (0, 0)),          # resident constant
            pl.BlockSpec((N_QUBITS, DIM), lambda i: (0, 0)),         # resident constant
        ],
        out_specs=pl.BlockSpec((N_QUBITS, TM), lambda i: (0, i)),
        compiler_params=pltpu.CompilerParams(dimension_semantics=("parallel",)),
    )(x8, selsc, selab, wri, sgnT)


def mlp_pallas(featT, w1, b1, w2, b2):
    D, B = featT.shape           # featT: (784, B), batch on the lane axis
    H = w1.shape[0]
    NO = w2.shape[0]
    if B < 256:
        TB = B                   # full-dim block (allowed even if < 128)
    else:
        # >=2 grid steps (lane-tile aligned) so v7x's second core gets MLP work too.
        TB = min(512, 128 * pl.cdiv(pl.cdiv(B, 2), 128))
    grid = (pl.cdiv(B, TB),)
    return pl.pallas_call(
        mlp_kernel,
        out_shape=jax.ShapeDtypeStruct((NO, B), jnp.float32),
        grid=grid,
        in_specs=[
            pl.BlockSpec((D, TB), lambda i: (0, i)),
            pl.BlockSpec((H, D), lambda i: (0, 0)),     # fc1 weight, resident (~196 KiB)
            pl.BlockSpec((H, 1), lambda i: (0, 0)),
            pl.BlockSpec((NO, H), lambda i: (0, 0)),
            pl.BlockSpec((NO, 1), lambda i: (0, 0)),
        ],
        out_specs=pl.BlockSpec((NO, TB), lambda i: (0, i)),
        compiler_params=pltpu.CompilerParams(dimension_semantics=("parallel",)),
    )(featT, w1, b1, w2, b2)


def net_forward(x, params):
    """x: (B, 1, 28, 28) float32, NCHW (channel 0 only is used, as in PyTorch)."""
    B = x.shape[0]
    h_out = (x.shape[2] - KSIZE) // STRIDE + 1     # 14
    w_out = (x.shape[3] - KSIZE) // STRIDE + 1     # 14
    img = x[:, 0].astype(jnp.float32)              # (B, 28, 28)
    # Feature-major, hw-major / batch-minor patch matrix:
    #   row    = patch pixel (row-major within the 2x2 window)
    #   column = (h*14 + w) * B + b
    # With this column order the quanv output reshaped to (784, B) is already
    # feat^T in torch.flatten(NCHW,1) (CHW) row order -> no post-quanv transpose.
    p5 = img.reshape(B, h_out, KSIZE, w_out, KSIZE)
    patchesT = p5.transpose(2, 4, 1, 3, 0).reshape(N_QUBITS, h_out * w_out * B)
    # Stack [x ; 1-x]: one in-kernel sin then gives both sin(pi*x/2) and cos(pi*x/2),
    # and the hot elementwise operand fills all 8 sublanes of each vreg.
    x8 = jnp.concatenate([patchesT, 1.0 - patchesT], axis=0)        # (8, P)
    expzT = quanv_pallas(x8, params["selsc"], params["selab"],
                         params["wri"], params["sgnT"])             # (4, 196*B)
    featT = expzT.reshape(N_QUBITS * h_out * w_out, B)              # (784, B), free reshape
    outT = mlp_pallas(featT, params["w1"], params["b1"],
                      params["w2"], params["b2"])                   # (16, B)
    return outT[:N_CLASSES, :].T                                    # (B, 10)


def init_params():
    key = jax.random.PRNGKey(0)
    k_q, k_w1, k_b1, k_w2, k_b2 = jax.random.split(key, 5)
    # QuanConv2D weights: uniform(0, 2*pi) * init_std(=1), scaled by w_mul at use.
    gain, lrmul = 2 ** 0.5, 1.0
    he_std = gain * 5 ** (-0.5)
    w_mul = he_std * lrmul
    theta = jax.random.uniform(k_q, (N_QUBITS * 3,), minval=0.0, maxval=2 * np.pi)
    w_eff = np.asarray(theta) * w_mul
    U = build_qconv_unitary(w_eff)                                     # 16x16 complex
    wri = jnp.asarray(np.concatenate([np.real(U), np.imag(U)], axis=0),
                      dtype=jnp.float32)                               # (32, 16)
    sgnT = jnp.asarray(build_z_signs().T)                              # (4, 16)
    sel_sc, sel_ab = build_pair_selectors()
    # fc1 / fc2 (PyTorch-style uniform init bounds).  Transposed-MLP layout:
    # fc1 weight is (64, 784) (PyTorch native), fc2 weight (10, 64) padded to 16 rows.
    fan1, fan2 = 14 * 14 * 4, HIDDEN
    bnd1, bnd2 = 1.0 / np.sqrt(fan1), 1.0 / np.sqrt(fan2)
    w1 = jax.random.uniform(k_w1, (HIDDEN, fan1), minval=-bnd1, maxval=bnd1,
                            dtype=jnp.float32)
    b1 = jax.random.uniform(k_b1, (HIDDEN, 1), minval=-bnd1, maxval=bnd1,
                            dtype=jnp.float32)
    w2 = jax.random.uniform(k_w2, (N_CLASSES, HIDDEN), minval=-bnd2, maxval=bnd2,
                            dtype=jnp.float32)
    b2 = jax.random.uniform(k_b2, (N_CLASSES, 1), minval=-bnd2, maxval=bnd2,
                            dtype=jnp.float32)
    w2_p = jnp.zeros((NCLS_PAD, HIDDEN), jnp.float32).at[:N_CLASSES, :].set(w2)
    b2_p = jnp.zeros((NCLS_PAD, 1), jnp.float32).at[:N_CLASSES, :].set(b2)
    return {"wri": wri, "sgnT": sgnT,
            "selsc": jnp.asarray(sel_sc), "selab": jnp.asarray(sel_ab),
            "w1": w1, "b1": b1, "w2": w2_p, "b2": b2_p}


if __name__ == "__main__":
    params = init_params()
    key = jax.random.PRNGKey(0)
    # MNIST-like input: the module requires 28x28 spatial (fc1 expects 14*14*4)
    x = jax.random.uniform(key, (2, 1, 28, 28), dtype=jnp.float32)
    out = jax.jit(net_forward)(x, params)
    out = jax.block_until_ready(out)
    assert out.shape == (2, N_CLASSES) and out.dtype == jnp.float32
    assert bool(jnp.all(jnp.isfinite(out)))
    print("KERNEL_OK")
</pallas_src>

<mosaic_0001>
module attributes {stable_mosaic.version = 11 : i64} {
  func.func @quanv_kernel(%arg0: i32, %arg1: memref<8x256xf32, #tpu.memory_space<vmem>>, %arg2: memref<16x8xf32, #tpu.memory_space<vmem>>, %arg3: memref<32x8xf32, #tpu.memory_space<vmem>>, %arg4: memref<32x16xf32, #tpu.memory_space<vmem>>, %arg5: memref<4x16xf32, #tpu.memory_space<vmem>>, %arg6: memref<4x256xf32, #tpu.memory_space<vmem>>) attributes {dimension_semantics = [#tpu.dimension_semantics<parallel>], iteration_bounds = array<i64: 2>, scalar_prefetch = 0 : i64, scratch_operands = 0 : i64, tpu.core_type = #tpu.core_type<tc>, window_params = [{transform_indices = @transform_0, window_bounds = array<i64: 8, 256>}, {pipeline_mode = #tpu.pipeline_mode<synchronous>, transform_indices = @transform_1, window_bounds = array<i64: 16, 8>}, {pipeline_mode = #tpu.pipeline_mode<synchronous>, transform_indices = @transform_2, window_bounds = array<i64: 32, 8>}, {pipeline_mode = #tpu.pipeline_mode<synchronous>, transform_indices = @transform_3, window_bounds = array<i64: 32, 16>}, {pipeline_mode = #tpu.pipeline_mode<synchronous>, transform_indices = @transform_4, window_bounds = array<i64: 4, 16>}, {transform_indices = @transform_5, window_bounds = array<i64: 4, 256>}]} {
    %c0 = arith.constant 0 : index
    %c0_0 = arith.constant 0 : index
    %0 = vector.load %arg1[%c0, %c0_0] : memref<8x256xf32, #tpu.memory_space<vmem>>, vector<8x256xf32>
    %cst = arith.constant 1.57079637 : f32
    %1 = vector.broadcast %cst : f32 to vector<8x256xf32>
    %2 = arith.mulf %1, %0 : vector<8x256xf32>
    %3 = math.sin %2 : vector<8x256xf32>
    %c0_1 = arith.constant 0 : index
    %c0_2 = arith.constant 0 : index
    %4 = vector.load %arg2[%c0_1, %c0_2] : memref<16x8xf32, #tpu.memory_space<vmem>>, vector<16x8xf32>
    %cst_3 = arith.constant dense<0.000000e+00> : vector<16x256xf32>
    %5 = tpu.matmul %4, %3, %cst_3 {dimension_numbers = #tpu.dot_dimension_numbers<[1], [0], [0], [1], [0, 0, 1, 1], [], []>} : vector<16x8xf32>, vector<8x256xf32>, vector<16x256xf32> -> vector<16x256xf32>
    %6 = vector.extract_strided_slice %5 {offsets = [0, 0], sizes = [8, 256], strides = [1, 1]} : vector<16x256xf32> to vector<8x256xf32>
    %7 = vector.extract_strided_slice %5 {offsets = [8, 0], sizes = [8, 256], strides = [1, 1]} : vector<16x256xf32> to vector<8x256xf32>
    %8 = arith.mulf %6, %7 : vector<8x256xf32>
    %c0_4 = arith.constant 0 : index
    %c0_5 = arith.constant 0 : index
    %9 = vector.load %arg3[%c0_4, %c0_5] : memref<32x8xf32, #tpu.memory_space<vmem>>, vector<32x8xf32>
    %cst_6 = arith.constant dense<0.000000e+00> : vector<32x256xf32>
    %10 = tpu.matmul %9, %8, %cst_6 {dimension_numbers = #tpu.dot_dimension_numbers<[1], [0], [0], [1], [0, 0, 1, 1], [], []>} : vector<32x8xf32>, vector<8x256xf32>, vector<32x256xf32> -> vector<32x256xf32>
    %11 = vector.extract_strided_slice %10 {offsets = [0, 0], sizes = [16, 256], strides = [1, 1]} : vector<32x256xf32> to vector<16x256xf32>
    %12 = vector.extract_strided_slice %10 {offsets = [16, 0], sizes = [16, 256], strides = [1, 1]} : vector<32x256xf32> to vector<16x256xf32>
    %13 = arith.mulf %11, %12 : vector<16x256xf32>
    %c0_7 = arith.constant 0 : index
    %c0_8 = arith.constant 0 : index
    %14 = vector.load %arg4[%c0_7, %c0_8] : memref<32x16xf32, #tpu.memory_space<vmem>>, vector<32x16xf32>
    %cst_9 = arith.constant dense<0.000000e+00> : vector<32x256xf32>
    %15 = tpu.matmul %14, %13, %cst_9 {dimension_numbers = #tpu.dot_dimension_numbers<[1], [0], [0], [1], [0, 0, 1, 1], [], []>} : vector<32x16xf32>, vector<16x256xf32>, vector<32x256xf32> -> vector<32x256xf32>
    %16 = vector.extract_strided_slice %15 {offsets = [0, 0], sizes = [16, 256], strides = [1, 1]} : vector<32x256xf32> to vector<16x256xf32>
    %17 = vector.extract_strided_slice %15 {offsets = [16, 0], sizes = [16, 256], strides = [1, 1]} : vector<32x256xf32> to vector<16x256xf32>
    %18 = arith.mulf %16, %16 : vector<16x256xf32>
    %19 = arith.mulf %17, %17 : vector<16x256xf32>
    %20 = arith.addf %18, %19 : vector<16x256xf32>
    %c0_10 = arith.constant 0 : index
    %c0_11 = arith.constant 0 : index
    %21 = vector.load %arg5[%c0_10, %c0_11] : memref<4x16xf32, #tpu.memory_space<vmem>>, vector<4x16xf32>
    %cst_12 = arith.constant dense<0.000000e+00> : vector<4x256xf32>
    %22 = tpu.matmul %21, %20, %cst_12 {dimension_numbers = #tpu.dot_dimension_numbers<[1], [0], [0], [1], [0, 0, 1, 1], [], []>} : vector<4x16xf32>, vector<16x256xf32>, vector<4x256xf32> -> vector<4x256xf32>
    %c0_13 = arith.constant 0 : index
    %c0_14 = arith.constant 0 : index
    %23 = vector.load %arg6[%c0_13, %c0_14] : memref<4x256xf32, #tpu.memory_space<vmem>>, vector<4x256xf32>
    tpu.vector_store %arg6[%c0_13, %c0_14], %22 {strides = array<i32>} : memref<4x256xf32, #tpu.memory_space<vmem>>, vector<4x256xf32>,
    return
  }
  func.func @transform_0(%arg0: i32) -> (i32, i32) {
    %c0_i32 = arith.constant 0 : i32
    %c0_i32_0 = arith.constant 0 : i32
    return %c0_i32, %arg0 : i32, i32
  }
  func.func @transform_1(%arg0: i32) -> (i32, i32) {
    %c0_i32 = arith.constant 0 : i32
    %c0_i32_0 = arith.constant 0 : i32
    %c0_i32_1 = arith.constant 0 : i32
    return %c0_i32, %c0_i32_0 : i32, i32
  }
  func.func @transform_2(%arg0: i32) -> (i32, i32) {
    %c0_i32 = arith.constant 0 : i32
    %c0_i32_0 = arith.constant 0 : i32
    %c0_i32_1 = arith.constant 0 : i32
    return %c0_i32, %c0_i32_0 : i32, i32
  }
  func.func @transform_3(%arg0: i32) -> (i32, i32) {
    %c0_i32 = arith.constant 0 : i32
    %c0_i32_0 = arith.constant 0 : i32
    %c0_i32_1 = arith.constant 0 : i32
    return %c0_i32, %c0_i32_0 : i32, i32
  }
  func.func @transform_4(%arg0: i32) -> (i32, i32) {
    %c0_i32 = arith.constant 0 : i32
    %c0_i32_0 = arith.constant 0 : i32
    %c0_i32_1 = arith.constant 0 : i32
    return %c0_i32, %c0_i32_0 : i32, i32
  }
  func.func @transform_5(%arg0: i32) -> (i32, i32) {
    %c0_i32 = arith.constant 0 : i32
    %c0_i32_0 = arith.constant 0 : i32
    return %c0_i32, %arg0 : i32, i32
  }
}

module attributes {stable_mosaic.version = 11 : i64} {
  func.func @mlp_kernel(%arg0: i32, %arg1: memref<784x2xf32, #tpu.memory_space<vmem>>, %arg2: memref<64x784xf32, #tpu.memory_space<vmem>>, %arg3: memref<64x1xf32, #tpu.memory_space<vmem>>, %arg4: memref<16x64xf32, #tpu.memory_space<vmem>>, %arg5: memref<16x1xf32, #tpu.memory_space<vmem>>, %arg6: memref<16x2xf32, #tpu.memory_space<vmem>>) attributes {dimension_semantics = [#tpu.dimension_semantics<parallel>], iteration_bounds = array<i64: 1>, scalar_prefetch = 0 : i64, scratch_operands = 0 : i64, tpu.core_type = #tpu.core_type<tc>, window_params = [{transform_indices = @transform_0, window_bounds = array<i64: 784, 2>}, {pipeline_mode = #tpu.pipeline_mode<synchronous>, transform_indices = @transform_1, window_bounds = array<i64: 64, 784>}, {pipeline_mode = #tpu.pipeline_mode<synchronous>, transform_indices = @transform_2, window_bounds = array<i64: 64, 1>}, {pipeline_mode = #tpu.pipeline_mode<synchronous>, transform_indices = @transform_3, window_bounds = array<i64: 16, 64>}, {pipeline_mode = #tpu.pipeline_mode<synchronous>, transform_indices = @transform_4, window_bounds = array<i64: 16, 1>}, {transform_indices = @transform_5, window_bounds = array<i64: 16, 2>}]} {
    %c0 = arith.constant 0 : index
    %c0_0 = arith.constant 0 : index
    %0 = vector.load %arg2[%c0, %c0_0] : memref<64x784xf32, #tpu.memory_space<vmem>>, vector<64x784xf32>
    %c0_1 = arith.constant 0 : index
    %c0_2 = arith.constant 0 : index
    %1 = vector.load %arg1[%c0_1, %c0_2] : memref<784x2xf32, #tpu.memory_space<vmem>>, vector<784x2xf32>
    %cst = arith.constant dense<0.000000e+00> : vector<64x2xf32>
    %2 = tpu.matmul %0, %1, %cst {dimension_numbers = #tpu.dot_dimension_numbers<[1], [0], [0], [1], [0, 0, 1, 1], [], []>} : vector<64x784xf32>, vector<784x2xf32>, vector<64x2xf32> -> vector<64x2xf32>
    %c0_3 = arith.constant 0 : index
    %c0_4 = arith.constant 0 : index
    %3 = vector.load %arg3[%c0_3, %c0_4] : memref<64x1xf32, #tpu.memory_space<vmem>>, vector<64x1xf32>
    %4 = vector.broadcast %3 : vector<64x1xf32> to vector<64x2xf32>
    %5 = arith.addf %2, %4 : vector<64x2xf32>
    %cst_5 = arith.constant 0.000000e+00 : f32
    %6 = vector.broadcast %cst_5 : f32 to vector<64x2xf32>
    %7 = arith.maximumf %5, %6 : vector<64x2xf32>
    %c0_6 = arith.constant 0 : index
    %c0_7 = arith.constant 0 : index
    %8 = vector.load %arg4[%c0_6, %c0_7] : memref<16x64xf32, #tpu.memory_space<vmem>>, vector<16x64xf32>
    %cst_8 = arith.constant dense<0.000000e+00> : vector<16x2xf32>
    %9 = tpu.matmul %8, %7, %cst_8 {dimension_numbers = #tpu.dot_dimension_numbers<[1], [0], [0], [1], [0, 0, 1, 1], [], []>} : vector<16x64xf32>, vector<64x2xf32>, vector<16x2xf32> -> vector<16x2xf32>
    %c0_9 = arith.constant 0 : index
    %c0_10 = arith.constant 0 : index
    %10 = vector.load %arg5[%c0_9, %c0_10] : memref<16x1xf32, #tpu.memory_space<vmem>>, vector<16x1xf32>
    %11 = vector.broadcast %10 : vector<16x1xf32> to vector<16x2xf32>
    %12 = arith.addf %9, %11 : vector<16x2xf32>
    %c0_11 = arith.constant 0 : index
    %c0_12 = arith.constant 0 : index
    %13 = vector.load %arg6[%c0_11, %c0_12] : memref<16x2xf32, #tpu.memory_space<vmem>>, vector<16x2xf32>
    tpu.vector_store %arg6[%c0_11, %c0_12], %12 {strides = array<i32>} : memref<16x2xf32, #tpu.memory_space<vmem>>, vector<16x2xf32>,
    return
  }
  func.func @transform_0(%arg0: i32) -> (i32, i32) {
    %c0_i32 = arith.constant 0 : i32
    %c0_i32_0 = arith.constant 0 : i32
    return %c0_i32, %arg0 : i32, i32
  }
  func.func @transform_1(%arg0: i32) -> (i32, i32) {
    %c0_i32 = arith.constant 0 : i32
    %c0_i32_0 = arith.constant 0 : i32
    %c0_i32_1 = arith.constant 0 : i32
    return %c0_i32, %c0_i32_0 : i32, i32
  }
  func.func @transform_2(%arg0: i32) -> (i32, i32) {
    %c0_i32 = arith.constant 0 : i32
    %c0_i32_0 = arith.constant 0 : i32
    %c0_i32_1 = arith.constant 0 : i32
    return %c0_i32, %c0_i32_0 : i32, i32
  }
  func.func @transform_3(%arg0: i32) -> (i32, i32) {
    %c0_i32 = arith.constant 0 : i32
    %c0_i32_0 = arith.constant 0 : i32
    %c0_i32_1 = arith.constant 0 : i32
    return %c0_i32, %c0_i32_0 : i32, i32
  }
  func.func @transform_4(%arg0: i32) -> (i32, i32) {
    %c0_i32 = arith.constant 0 : i32
    %c0_i32_0 = arith.constant 0 : i32
    %c0_i32_1 = arith.constant 0 : i32
    return %c0_i32, %c0_i32_0 : i32, i32
  }
  func.func @transform_5(%arg0: i32) -> (i32, i32) {
    %c0_i32 = arith.constant 0 : i32
    %c0_i32_0 = arith.constant 0 : i32
    return %c0_i32, %arg0 : i32, i32
  }
}

</mosaic_0001>

<bundles_post_ra>
// kernel: squeeze.1
= control target key start
LH: loop header
LB: loop body
LE: loop exit
PB: predicated region body
PF: predicated region fallthrough
CT: control target
= control target key end

     0   :  { %vm282_vm0 = vcmask 1047556   ;;  %s2270_s27 = smov 126   ;;  %s2272_s5 = smov 122   ;;  %vm142_vm1 = vcmask 15360   ;;  %s4092_s0 = inlined_call_operand.vmem [shape: f32[2,1,28,28], index: 0, kind: input, shape index: {}]   ;;  %s4093_s1 = inlined_call_operand.vmem [shape: f32[2,14,2,14,2], index: 1, kind: output, shape index: {}]  }
   0x1   :  { %v1863_v0 = vld [vmem:[%s4092_s0 + $0x6] sm:$0x3]  ;;  %v1864_v1 = vld [vmem:[%s4092_s0 + $0x4] sm:$0x3]  ;;  %v1865_v2 = vld [vmem:[%s4092_s0 + $0x2] sm:$0x3] }
   0x2   :  { %129 = vst [vmem:[#allocation0 + $0x18] sm:$0x3] %v1863_v0  ;;  %134 = vst [vmem:[#allocation0 + $0x10] sm:$0x3] %v1864_v1  ;;  %v139_v3 = vld [vmem:[%s4092_s0] sm:$0x3] }
   0x3   :  { %138 = vst [vmem:[#allocation0 + $0x8] sm:$0x3] %v1865_v2  ;;  %v1859_v4 = vld [vmem:[%s4092_s0 + $0xe] sm:$0x3]  ;;  %140 = vst [vmem:[#allocation0] sm:$0x3] %v139_v3 }
   0x4   :  { %109 = vst [vmem:[#allocation0 + $0x38] sm:$0x3] %v1859_v4  ;;  %v1860_v5 = vld [vmem:[%s4092_s0 + $0xc] sm:$0x3]  ;;  %v1861_v6 = vld [vmem:[%s4092_s0 + $0xa] sm:$0x3] }
   0x5   :  { %v1862_v7 = vld [vmem:[%s4092_s0 + $0x8] sm:$0x3]  ;;  %114 = vst [vmem:[#allocation0 + $0x30] sm:$0x3] %v1860_v5  ;;  %119 = vst [vmem:[#allocation0 + $0x28] sm:$0x3] %v1861_v6 }
   0x6   :  { %124 = vst [vmem:[#allocation0 + $0x20] sm:$0x3] %v1862_v7  ;;  %v1855_v8 = vld [vmem:[%s4092_s0 + $0x16] sm:$0x3]  ;;  %v1856_v9 = vld [vmem:[%s4092_s0 + $0x14] sm:$0x3] }
   0x7   :  { %v1857_v10 = vld [vmem:[%s4092_s0 + $0x12] sm:$0x3]  ;;  %89 = vst [vmem:[#allocation0 + $0x58] sm:$0x3] %v1855_v8  ;;  %94 = vst [vmem:[#allocation0 + $0x50] sm:$0x3] %v1856_v9 }
   0x8   :  { %99 = vst [vmem:[#allocation0 + $0x48] sm:$0x3] %v1857_v10  ;;  %v1858_v11 = vld [vmem:[%s4092_s0 + $0x10] sm:$0x3]  ;;  %v1851_v12 = vld [vmem:[%s4092_s0 + $0x1e] sm:$0x3] }
   0x9   :  { %v1852_v13 = vld [vmem:[%s4092_s0 + $0x1c] sm:$0x3]  ;;  %104 = vst [vmem:[#allocation0 + $0x40] sm:$0x3] %v1858_v11  ;;  %69 = vst [vmem:[#allocation0 + $0x78] sm:$0x3] %v1851_v12 }
   0xa   :  { %74 = vst [vmem:[#allocation0 + $0x70] sm:$0x3] %v1852_v13  ;;  %v1853_v14 = vld [vmem:[%s4092_s0 + $0x1a] sm:$0x3]  ;;  %v1854_v15 = vld [vmem:[%s4092_s0 + $0x18] sm:$0x3] }
   0xb   :  { %v1847_v16 = vld [vmem:[%s4092_s0 + $0x26] sm:$0x3]  ;;  %79 = vst [vmem:[#allocation0 + $0x68] sm:$0x3] %v1853_v14  ;;  %84 = vst [vmem:[#allocation0 + $0x60] sm:$0x3] %v1854_v15 }
   0xc   :  { %49 = vst [vmem:[#allocation0 + $0x98] sm:$0x3] %v1847_v16  ;;  %v1848_v17 = vld [vmem:[%s4092_s0 + $0x24] sm:$0x3]  ;;  %v1849_v18 = vld [vmem:[%s4092_s0 + $0x22] sm:$0x3] }
   0xd   :  { %v1850_v19 = vld [vmem:[%s4092_s0 + $0x20] sm:$0x3]  ;;  %54 = vst [vmem:[#allocation0 + $0x90] sm:$0x3] %v1848_v17  ;;  %59 = vst [vmem:[#allocation0 + $0x88] sm:$0x3] %v1849_v18 }
   0xe   :  { %64 = vst [vmem:[#allocation0 + $0x80] sm:$0x3] %v1850_v19  ;;  %v1843_v20 = vld [vmem:[%s4092_s0 + $0x2e] sm:$0x3]  ;;  %v1844_v21 = vld [vmem:[%s4092_s0 + $0x2c] sm:$0x3] }
   0xf   :  { %v1845_v22 = vld [vmem:[%s4092_s0 + $0x2a] sm:$0x3]  ;;  %v281_v23 = vld.sshfl [vmem:[#allocation0 + $0x10] sm:$0xff pattern:$0x98100000]   ;;  %s2273_s6 = smov 120  }
  0x10   :  { %29 = vst [vmem:[#allocation0 + $0xb8] sm:$0x3] %v1843_v20  ;;  %34 = vst [vmem:[#allocation0 + $0xb0] sm:$0x3] %v1844_v21  ;;  %v1846_v24 = vld [vmem:[%s4092_s0 + $0x28] sm:$0x3] }
  0x11   :  { %39 = vst [vmem:[#allocation0 + $0xa8] sm:$0x3] %v1845_v22  ;;  %v279_v25 = vld.sshfl [vmem:[#allocation0] sm:$0xff pattern:$0x99999810]   ;;  %s2274_s7 = smov 118  }
  0x12   :  { %44 = vst [vmem:[#allocation0 + $0xa0] sm:$0x3] %v1846_v24  ;;  %v1839_v26 = vld [vmem:[%s4092_s0 + $0x36] sm:$0x3]  ;;  %v2369_v27 = vsel %vm282_vm0, %v281_v23, %v279_v25  ;;  %v1840_v31 = vld [vmem:[%s4092_s0 + $0x34] sm:$0x3] }
  0x13   :  { %v296_v28 = vld.sshfl [vmem:[#allocation0 + $0x20] sm:$0xff pattern:$0x99999810]   ;;  %v298_v29 = vld.sshfl [vmem:[#allocation0 + $0x30] sm:$0xff pattern:$0x98100000]   ;;  %284 = vrot.lane.b32.xlu0 %v2369_v27, %s2270_s27 }
  0x14   :  { %9 = vst [vmem:[#allocation0 + $0xd8] sm:$0x3] %v1839_v26  ;;  %v315_v30 = vld.sshfl [vmem:[#allocation0 + $0x50] sm:$0xff pattern:$0x98100000]   ;;  %v2376_v32 = vsel %vm282_vm0, %v298_v29, %v296_v28  ;;  %s2275_s8 = smov 116  }
  0x15   :  { %v313_v33 = vld.sshfl [vmem:[#allocation0 + $0x40] sm:$0xff pattern:$0x99999810]   ;;  %v332_v34 = vld.sshfl [vmem:[#allocation0 + $0x70] sm:$0xff pattern:$0x98100000]  }
  0x16   :  { %14 = vst [vmem:[#allocation0 + $0xd0] sm:$0x3] %v1840_v31  ;;  %v2379_v35 = vsel %vm282_vm0, %v315_v30, %v313_v33  ;;  %v330_v36 = vld.sshfl [vmem:[#allocation0 + $0x60] sm:$0xff pattern:$0x99999810]   ;;  %s2276_s9 = smov 114  }
  0x17   :  { %v1841_v37 = vld [vmem:[%s4092_s0 + $0x32] sm:$0x3]  ;;  %318 = vrot.lane.b32.xlu1 %v2379_v35, %s2270_s27  ;;  %v347_v38 = vld.sshfl [vmem:[#allocation0 + $0x80] sm:$0xff pattern:$0x99999810]   ;;  %301 = vrot.lane.b32.xlu0 %v2376_v32, %s2270_s27  ;;  %v2387_v40 = vsel %vm282_vm0, %v332_v34, %v330_v36  ;;  %s2277_s10 = smov 112  }
  0x18   :  { %v349_v39 = vld.sshfl [vmem:[#allocation0 + $0x90] sm:$0xff pattern:$0x98100000]   ;;  %19 = vst [vmem:[#allocation0 + $0xc8] sm:$0x3] %v1841_v37  ;;  %s2278_s11 = smov 110  }
  0x19   :  { %v1842_v41 = vld [vmem:[%s4092_s0 + $0x30] sm:$0x3]  ;;  %v2393_v42 = vsel %vm282_vm0, %v349_v39, %v347_v38  ;;  %v364_v43 = vld.sshfl [vmem:[#allocation0 + $0xa0] sm:$0xff pattern:$0x99999810]   ;;  %s2271_s0 = smov 124  }
  0x1a   :  { %v366_v44 = vld.sshfl [vmem:[#allocation0 + $0xb0] sm:$0xff pattern:$0x98100000]   ;;  %24 = vst [vmem:[#allocation0 + $0xc0] sm:$0x3] %v1842_v41  ;;  %s2279_s30 = smov 108  }
  0x1b   :  { %335 = vrot.lane.b32.xlu1 %v2387_v40, %s2270_s27  ;;  %352 = vrot.lane.b32.xlu0 %v2393_v42, %s2270_s27  ;;  %v2398_v45 = vsel %vm282_vm0, %v366_v44, %v364_v43  ;;  %s2281_s24 = smov 104   ;;  %v1695_v9 = vld.sshfl [vmem:[#allocation0] sm:$0xff pattern:$0x99999810]   ;;  %v150_v24 = vld [vmem:[#allocation0 + $0x10] sm:$0x3]  }
  0x1c   :  { %v1697_v11 = vld.sshfl [vmem:[#allocation0 + $0x10] sm:$0xff pattern:$0x98100000]   ;;  %v1712_v13 = vld.sshfl [vmem:[#allocation0 + $0x20] sm:$0xff pattern:$0x99999810]  }
  0x1d   :  { %v383_v46 = vld.sshfl [vmem:[#allocation0 + $0xd0] sm:$0xff pattern:$0x98100000]   ;;  %v1729_v15 = vld.sshfl [vmem:[#allocation0 + $0x40] sm:$0xff pattern:$0x99999810]   ;;  %v1699_v17 = vsel %vm282_vm0, %v1697_v11, %v1695_v9 }
  0x1e   :  { %v1714_v14 = vld.sshfl [vmem:[#allocation0 + $0x30] sm:$0xff pattern:$0x98100000]   ;;  %v1746_v18 = vld.sshfl [vmem:[#allocation0 + $0x60] sm:$0xff pattern:$0x99999810]  }
  0x1f   :  { %369 = vrot.lane.b32.xlu1 %v2398_v45, %s2270_s27  ;;  %v1731_v16 = vld.sshfl [vmem:[#allocation0 + $0x50] sm:$0xff pattern:$0x98100000]   ;;  %v1716_v21 = vsel %vm282_vm0, %v1714_v14, %v1712_v13  ;;  %v141_v22 = vld [vmem:[#allocation0] sm:$0x3]   ;;  %s2282_s29 = smov 102  }
  0x20   :  { %v1748_v19 = vld.sshfl [vmem:[#allocation0 + $0x70] sm:$0xff pattern:$0x98100000]   ;;  %v145_v23 = vld [vmem:[#allocation0 + $0x8] sm:$0x3]   ;;  %v1733_v34 = vsel %vm282_vm0, %v1731_v16, %v1729_v15 }
  0x21   :  { %v381_v47 = vld.sshfl [vmem:[#allocation0 + $0xc0] sm:$0xff pattern:$0x99999810]   ;;  %143 = vst.msk [vmem:[%s4093_s1] ss:$16 sm:$0x3] %vm142_vm1, %v141_v22   ;;  %v1750_v41 = vsel %vm282_vm0, %v1748_v19, %v1746_v18 }
  0x22   :  { %v2402_v48 = vsel %vm282_vm0, %v383_v46, %v381_v47  ;;  %1866 = vst.msk [vmem:[%s4093_s1 + $0x20] ss:$16 sm:$0x3] %vm142_vm1, %v145_v23   ;;  %1867 = vst.msk [vmem:[%s4093_s1 + $0x40] ss:$16 sm:$0x3] %vm142_vm1, %v150_v24  }
  0x23   :  { %386 = vrot.lane.b32.xlu0 %v2402_v48, %s2270_s27  ;;  %402 = vrot.lane.b32.xlu1 %v2369_v27, %s2271_s0  ;;  %s2280_s27 = smov 106   ;;  %v155_v26 = vld [vmem:[#allocation0 + $0x18] sm:$0x3]   ;;  %v165_v28 = vld [vmem:[#allocation0 + $0x28] sm:$0x3]  }
  0x24   :  { %v1763_v29 = vld.sshfl [vmem:[#allocation0 + $0x80] sm:$0xff pattern:$0x99999810]   ;;  %v1765_v30 = vld.sshfl [vmem:[#allocation0 + $0x90] sm:$0xff pattern:$0x98100000]  }
  0x25   :  { %1868 = vst.msk [vmem:[%s4093_s1 + $0x60] ss:$16 sm:$0x3] %vm142_vm1, %v155_v26   ;;  %1870 = vst.msk [vmem:[%s4093_s1 + $0xa0] ss:$16 sm:$0x3] %vm142_vm1, %v165_v28  }
  0x26   :  { %v170_v31 = vld [vmem:[#allocation0 + $0x30] sm:$0x3]   ;;  %v180_v33 = vld [vmem:[#allocation0 + $0x40] sm:$0x3]   ;;  %v185_v37 = vld [vmem:[#allocation0 + $0x48] sm:$0x3]  }
  0x27   :  { %419 = vrot.lane.b32.xlu0 %v2376_v32, %s2271_s0  ;;  %436 = vrot.lane.b32.xlu1 %v2379_v35, %s2271_s0  ;;  %v1782_v36 = vld.sshfl [vmem:[#allocation0 + $0xb0] sm:$0xff pattern:$0x98100000]   ;;  %1871 = vst.msk [vmem:[%s4093_s1 + $0xc0] ss:$16 sm:$0x3] %vm142_vm1, %v170_v31  }
  0x28   :  { %1873 = vst.msk [vmem:[%s4093_s1 + $0x100] ss:$16 sm:$0x3] %vm142_vm1, %v180_v33   ;;  %v190_v38 = vld [vmem:[#allocation0 + $0x50] sm:$0x3]  }
  0x29   :  { %v195_v39 = vld [vmem:[#allocation0 + $0x58] sm:$0x3]   ;;  %1874 = vst.msk [vmem:[%s4093_s1 + $0x120] ss:$16 sm:$0x3] %vm142_vm1, %v185_v37  }
  0x2a   :  { %1875 = vst.msk [vmem:[%s4093_s1 + $0x140] ss:$16 sm:$0x3] %vm142_vm1, %v190_v38   ;;  %1876 = vst.msk [vmem:[%s4093_s1 + $0x160] ss:$16 sm:$0x3] %vm142_vm1, %v195_v39  }
  0x2b   :  { %453 = vrot.lane.b32.xlu0 %v2387_v40, %s2271_s0  ;;  %470 = vrot.lane.b32.xlu1 %v2393_v42, %s2271_s0  ;;  %v205_v43 = vld [vmem:[#allocation0 + $0x68] sm:$0x3]   ;;  %v210_v44 = vld [vmem:[#allocation0 + $0x70] sm:$0x3]   ;;  %v215_v46 = vld [vmem:[#allocation0 + $0x78] sm:$0x3]  }
  0x2c   :  { %1878 = vst.msk [vmem:[%s4093_s1 + $0x1a0] ss:$16 sm:$0x3] %vm142_vm1, %v205_v43   ;;  %1879 = vst.msk [vmem:[%s4093_s1 + $0x1c0] ss:$16 sm:$0x3] %vm142_vm1, %v210_v44  }
  0x2d   :  { %v220_v47 = vld [vmem:[#allocation0 + $0x80] sm:$0x3]   ;;  %1880 = vst.msk [vmem:[%s4093_s1 + $0x1e0] ss:$16 sm:$0x3] %vm142_vm1, %v215_v46  }
  0x2e   :  { %1881 = vst.msk [vmem:[%s4093_s1 + $0x200] ss:$16 sm:$0x3] %vm142_vm1, %v220_v47  }
  0x2f   :  { %487 = vrot.lane.b32.xlu0 %v2398_v45, %s2271_s0  ;;  %504 = vrot.lane.b32.xlu1 %v2402_v48, %s2271_s0 }
  0x33   :  { %520 = vrot.lane.b32.xlu0 %v2369_v27, %s2272_s5  ;;  %537 = vrot.lane.b32.xlu1 %v2376_v32, %s2272_s5 }
  0x37   :  { %554 = vrot.lane.b32.xlu0 %v2379_v35, %s2272_s5  ;;  %571 = vrot.lane.b32.xlu1 %v2387_v40, %s2272_s5 }
  0x3b   :  { %588 = vrot.lane.b32.xlu0 %v2393_v42, %s2272_s5  ;;  %605 = vrot.lane.b32.xlu1 %v2398_v45, %s2272_s5 }
  0x3f   :  { %622 = vrot.lane.b32.xlu0 %v2402_v48, %s2272_s5  ;;  %638 = vrot.lane.b32.xlu1 %v2369_v27, %s2273_s6 }
  0x43   :  { %655 = vrot.lane.b32.xlu0 %v2376_v32, %s2273_s6  ;;  %672 = vrot.lane.b32.xlu1 %v2379_v35, %s2273_s6 }
  0x47   :  { %689 = vrot.lane.b32.xlu0 %v2387_v40, %s2273_s6  ;;  %706 = vrot.lane.b32.xlu1 %v2393_v42, %s2273_s6 }
  0x4b   :  { %723 = vrot.lane.b32.xlu0 %v2398_v45, %s2273_s6  ;;  %740 = vrot.lane.b32.xlu1 %v2402_v48, %s2273_s6 }
  0x4f   :  { %756 = vrot.lane.b32.xlu0 %v2369_v27, %s2274_s7  ;;  %773 = vrot.lane.b32.xlu1 %v2376_v32, %s2274_s7 }
  0x53   :  { %790 = vrot.lane.b32.xlu0 %v2379_v35, %s2274_s7  ;;  %807 = vrot.lane.b32.xlu1 %v2387_v40, %s2274_s7 }
  0x57   :  { %824 = vrot.lane.b32.xlu0 %v2393_v42, %s2274_s7  ;;  %841 = vrot.lane.b32.xlu1 %v2398_v45, %s2274_s7 }
  0x5b   :  { %858 = vrot.lane.b32.xlu0 %v2402_v48, %s2274_s7  ;;  %874 = vrot.lane.b32.xlu1 %v2369_v27, %s2275_s8 }
  0x5f   :  { %891 = vrot.lane.b32.xlu0 %v2376_v32, %s2275_s8  ;;  %908 = vrot.lane.b32.xlu1 %v2379_v35, %s2275_s8 }
  0x63   :  { %925 = vrot.lane.b32.xlu0 %v2387_v40, %s2275_s8  ;;  %942 = vrot.lane.b32.xlu1 %v2393_v42, %s2275_s8 }
  0x67   :  { %959 = vrot.lane.b32.xlu0 %v2398_v45, %s2275_s8  ;;  %976 = vrot.lane.b32.xlu1 %v2402_v48, %s2275_s8 }
  0x6b   :  { %992 = vrot.lane.b32.xlu0 %v2369_v27, %s2276_s9  ;;  %1009 = vrot.lane.b32.xlu1 %v2376_v32, %s2276_s9 }
  0x6f   :  { %1026 = vrot.lane.b32.xlu0 %v2379_v35, %s2276_s9  ;;  %1043 = vrot.lane.b32.xlu1 %v2387_v40, %s2276_s9 }
  0x73   :  { %1060 = vrot.lane.b32.xlu0 %v2393_v42, %s2276_s9  ;;  %1077 = vrot.lane.b32.xlu1 %v2398_v45, %s2276_s9 }
  0x77   :  { %1094 = vrot.lane.b32.xlu0 %v2402_v48, %s2276_s9  ;;  %1110 = vrot.lane.b32.xlu1 %v2369_v27, %s2277_s10 }
  0x7b   :  { %1127 = vrot.lane.b32.xlu0 %v2376_v32, %s2277_s10  ;;  %1144 = vrot.lane.b32.xlu1 %v2379_v35, %s2277_s10 }
  0x7f   :  { %1161 = vrot.lane.b32.xlu0 %v2387_v40, %s2277_s10  ;;  %1178 = vrot.lane.b32.xlu1 %v2393_v42, %s2277_s10 }
  0x83   :  { %1195 = vrot.lane.b32.xlu0 %v2398_v45, %s2277_s10  ;;  %1212 = vrot.lane.b32.xlu1 %v2402_v48, %s2277_s10 }
  0x85   :  { %v285_v49 = vpop.permute.xlu0 %284  }
  0x86   :  { %1893 = vst.msk [vmem:[%s4093_s1 + $0x1] ss:$16 sm:$0x3] %vm142_vm1, %v285_v49   ;;  %1894 = vst.msk [vmem:[%s4093_s1 + $0x1] ss:$16 sm:$0xc] %vm142_vm1, %v285_v49  }
  0x87   :  { %1228 = vrot.lane.b32.xlu0 %v2369_v27, %s2278_s11  ;;  %1895 = vst.msk [vmem:[%s4093_s1 + $0x1] ss:$16 sm:$0x30] %vm142_vm1, %v285_v49   ;;  %1896 = vst.msk [vmem:[%s4093_s1 + $0x1] ss:$16 sm:$0xc0] %vm142_vm1, %v285_v49   ;;  %1245 = vrot.lane.b32.xlu1 %v2376_v32, %s2278_s11 }
  0x88   :  { %v1797_v49 = vld.sshfl [vmem:[#allocation0 + $0xc0] sm:$0xff pattern:$0x99999810]  }
  0x89   :  { %v319_v50 = vpop.permute.xlu1 %318   ;;  %v302_v51 = vpop.permute.xlu0 %301  }
  0x8a   :  { %1901 = vst.msk [vmem:[%s4093_s1 + $0x101] ss:$16 sm:$0x3] %vm142_vm1, %v319_v50   ;;  %1902 = vst.msk [vmem:[%s4093_s1 + $0x101] ss:$16 sm:$0xc] %vm142_vm1, %v319_v50  }
  0x8b   :  { %1262 = vrot.lane.b32.xlu0 %v2379_v35, %s2278_s11  ;;  %1903 = vst.msk [vmem:[%s4093_s1 + $0x101] ss:$16 sm:$0x30] %vm142_vm1, %v319_v50   ;;  %1904 = vst.msk [vmem:[%s4093_s1 + $0x101] ss:$16 sm:$0xc0] %vm142_vm1, %v319_v50   ;;  %1279 = vrot.lane.b32.xlu1 %v2387_v40, %s2278_s11 }
  0x8c   :  { %1897 = vst.msk [vmem:[%s4093_s1 + $0x81] ss:$16 sm:$0x3] %vm142_vm1, %v302_v51   ;;  %1898 = vst.msk [vmem:[%s4093_s1 + $0x81] ss:$16 sm:$0xc] %vm142_vm1, %v302_v51  }
  0x8d   :  { %1899 = vst.msk [vmem:[%s4093_s1 + $0x81] ss:$16 sm:$0x30] %vm142_vm1, %v302_v51   ;;  %1900 = vst.msk [vmem:[%s4093_s1 + $0x81] ss:$16 sm:$0xc0] %vm142_vm1, %v302_v51   ;;  %v336_v52 = vpop.permute.xlu1 %335   ;;  %v353_v53 = vpop.permute.xlu0 %352  }
  0x8e   :  { %1905 = vst.msk [vmem:[%s4093_s1 + $0x181] ss:$16 sm:$0x3] %vm142_vm1, %v336_v52   ;;  %1906 = vst.msk [vmem:[%s4093_s1 + $0x181] ss:$16 sm:$0xc] %vm142_vm1, %v336_v52  }
  0x8f   :  { %1296 = vrot.lane.b32.xlu0 %v2393_v42, %s2278_s11  ;;  %1907 = vst.msk [vmem:[%s4093_s1 + $0x181] ss:$16 sm:$0x30] %vm142_vm1, %v336_v52   ;;  %1908 = vst.msk [vmem:[%s4093_s1 + $0x181] ss:$16 sm:$0xc0] %vm142_vm1, %v336_v52   ;;  %1313 = vrot.lane.b32.xlu1 %v2398_v45, %s2278_s11 }
  0x90   :  { %1909 = vst.msk [vmem:[%s4093_s1 + $0x201] ss:$16 sm:$0x3] %vm142_vm1, %v353_v53   ;;  %1910 = vst.msk [vmem:[%s4093_s1 + $0x201] ss:$16 sm:$0xc] %vm142_vm1, %v353_v53  }
  0x91   :  { %1911 = vst.msk [vmem:[%s4093_s1 + $0x201] ss:$16 sm:$0x30] %vm142_vm1, %v353_v53   ;;  %1912 = vst.msk [vmem:[%s4093_s1 + $0x201] ss:$16 sm:$0xc0] %vm142_vm1, %v353_v53   ;;  %v370_v54 = vpop.permute.xlu1 %369  }
  0x92   :  { %1913 = vst.msk [vmem:[%s4093_s1 + $0x281] ss:$16 sm:$0x3] %vm142_vm1, %v370_v54   ;;  %1914 = vst.msk [vmem:[%s4093_s1 + $0x281] ss:$16 sm:$0xc] %vm142_vm1, %v370_v54  }
  0x93   :  { %1330 = vrot.lane.b32.xlu0 %v2402_v48, %s2278_s11  ;;  %1915 = vst.msk [vmem:[%s4093_s1 + $0x281] ss:$16 sm:$0x30] %vm142_vm1, %v370_v54   ;;  %1916 = vst.msk [vmem:[%s4093_s1 + $0x281] ss:$16 sm:$0xc0] %vm142_vm1, %v370_v54   ;;  %1346 = vrot.lane.b32.xlu1 %v2369_v27, %s2279_s30  ;;  %v1767_v54 = vsel %vm282_vm0, %v1765_v30, %v1763_v29 }
  0x94   :  { %v1799_v50 = vld.sshfl [vmem:[#allocation0 + $0xd0] sm:$0xff pattern:$0x98100000]   ;;  %v240_v53 = vld [vmem:[#allocation0 + $0xa0] sm:$0x3]  }
  0x95   :  { %v387_v55 = vpop.permute.xlu0 %386   ;;  %v403_v56 = vpop.permute.xlu1 %402   ;;  %v230_v51 = vld [vmem:[#allocation0 + $0x90] sm:$0x3]   ;;  %v235_v52 = vld [vmem:[#allocation0 + $0x98] sm:$0x3]  }
  0x96   :  { %1917 = vst.msk [vmem:[%s4093_s1 + $0x301] ss:$16 sm:$0x3] %vm142_vm1, %v387_v55   ;;  %1918 = vst.msk [vmem:[%s4093_s1 + $0x301] ss:$16 sm:$0xc] %vm142_vm1, %v387_v55  }
  0x97   :  { %1919 = vst.msk [vmem:[%s4093_s1 + $0x301] ss:$16 sm:$0x30] %vm142_vm1, %v387_v55   ;;  %1920 = vst.msk [vmem:[%s4093_s1 + $0x301] ss:$16 sm:$0xc0] %vm142_vm1, %v387_v55   ;;  %1363 = vrot.lane.b32.xlu0 %v2376_v32, %s2279_s30  ;;  %1380 = vrot.lane.b32.xlu1 %v2379_v35, %s2279_s30 }
  0x98   :  { %1921 = vst.msk [vmem:[%s4093_s1 + $0x2] ss:$16 sm:$0x3] %vm142_vm1, %v403_v56   ;;  %1922 = vst.msk [vmem:[%s4093_s1 + $0x2] ss:$16 sm:$0xc] %vm142_vm1, %v403_v56  }
  0x99   :  { %1923 = vst.msk [vmem:[%s4093_s1 + $0x2] ss:$16 sm:$0x30] %vm142_vm1, %v403_v56   ;;  %1924 = vst.msk [vmem:[%s4093_s1 + $0x2] ss:$16 sm:$0xc0] %vm142_vm1, %v403_v56   ;;  %v420_v57 = vpop.permute.xlu0 %419   ;;  %v437_v58 = vpop.permute.xlu1 %436  }
  0x9a   :  { %1925 = vst.msk [vmem:[%s4093_s1 + $0x82] ss:$16 sm:$0x3] %vm142_vm1, %v420_v57   ;;  %1926 = vst.msk [vmem:[%s4093_s1 + $0x82] ss:$16 sm:$0xc] %vm142_vm1, %v420_v57  }
  0x9b   :  { %1927 = vst.msk [vmem:[%s4093_s1 + $0x82] ss:$16 sm:$0x30] %vm142_vm1, %v420_v57   ;;  %1928 = vst.msk [vmem:[%s4093_s1 + $0x82] ss:$16 sm:$0xc0] %vm142_vm1, %v420_v57   ;;  %1397 = vrot.lane.b32.xlu0 %v2387_v40, %s2279_s30  ;;  %1414 = vrot.lane.b32.xlu1 %v2393_v42, %s2279_s30 }
  0x9c   :  { %1929 = vst.msk [vmem:[%s4093_s1 + $0x102] ss:$16 sm:$0x3] %vm142_vm1, %v437_v58   ;;  %1930 = vst.msk [vmem:[%s4093_s1 + $0x102] ss:$16 sm:$0xc] %vm142_vm1, %v437_v58  }
  0x9d   :  { %1931 = vst.msk [vmem:[%s4093_s1 + $0x102] ss:$16 sm:$0x30] %vm142_vm1, %v437_v58   ;;  %1932 = vst.msk [vmem:[%s4093_s1 + $0x102] ss:$16 sm:$0xc0] %vm142_vm1, %v437_v58   ;;  %v454_v59 = vpop.permute.xlu0 %453   ;;  %v471_v60 = vpop.permute.xlu1 %470  }
  0x9e   :  { %1933 = vst.msk [vmem:[%s4093_s1 + $0x182] ss:$16 sm:$0x3] %vm142_vm1, %v454_v59   ;;  %1934 = vst.msk [vmem:[%s4093_s1 + $0x182] ss:$16 sm:$0xc] %vm142_vm1, %v454_v59  }
  0x9f   :  { %1935 = vst.msk [vmem:[%s4093_s1 + $0x182] ss:$16 sm:$0x30] %vm142_vm1, %v454_v59   ;;  %1936 = vst.msk [vmem:[%s4093_s1 + $0x182] ss:$16 sm:$0xc0] %vm142_vm1, %v454_v59   ;;  %1431 = vrot.lane.b32.xlu0 %v2398_v45, %s2279_s30  ;;  %1448 = vrot.lane.b32.xlu1 %v2402_v48, %s2279_s30 }
  0xa0   :  { %1937 = vst.msk [vmem:[%s4093_s1 + $0x202] ss:$16 sm:$0x3] %vm142_vm1, %v471_v60   ;;  %1938 = vst.msk [vmem:[%s4093_s1 + $0x202] ss:$16 sm:$0xc] %vm142_vm1, %v471_v60  }
  0xa1   :  { %1939 = vst.msk [vmem:[%s4093_s1 + $0x202] ss:$16 sm:$0x30] %vm142_vm1, %v471_v60   ;;  %1940 = vst.msk [vmem:[%s4093_s1 + $0x202] ss:$16 sm:$0xc0] %vm142_vm1, %v471_v60   ;;  %v488_v61 = vpop.permute.xlu0 %487   ;;  %v505_v62 = vpop.permute.xlu1 %504  }
  0xa2   :  { %1941 = vst.msk [vmem:[%s4093_s1 + $0x282] ss:$16 sm:$0x3] %vm142_vm1, %v488_v61   ;;  %1942 = vst.msk [vmem:[%s4093_s1 + $0x282] ss:$16 sm:$0xc] %vm142_vm1, %v488_v61  }
  0xa3   :  { %1943 = vst.msk [vmem:[%s4093_s1 + $0x282] ss:$16 sm:$0x30] %vm142_vm1, %v488_v61   ;;  %1944 = vst.msk [vmem:[%s4093_s1 + $0x282] ss:$16 sm:$0xc0] %vm142_vm1, %v488_v61   ;;  %1464 = vrot.lane.b32.xlu0 %v2369_v27, %s2280_s27  ;;  %1481 = vrot.lane.b32.xlu1 %v2376_v32, %s2280_s27 }
  0xa4   :  { %1945 = vst.msk [vmem:[%s4093_s1 + $0x302] ss:$16 sm:$0x3] %vm142_vm1, %v505_v62   ;;  %1946 = vst.msk [vmem:[%s4093_s1 + $0x302] ss:$16 sm:$0xc] %vm142_vm1, %v505_v62  }
  0xa5   :  { %1947 = vst.msk [vmem:[%s4093_s1 + $0x302] ss:$16 sm:$0x30] %vm142_vm1, %v505_v62   ;;  %1948 = vst.msk [vmem:[%s4093_s1 + $0x302] ss:$16 sm:$0xc0] %vm142_vm1, %v505_v62   ;;  %v521_v63 = vpop.permute.xlu0 %520   ;;  %v538_v0 = vpop.permute.xlu1 %537  }
  0xa6   :  { %1949 = vst.msk [vmem:[%s4093_s1 + $0x3] ss:$16 sm:$0x3] %vm142_vm1, %v521_v63   ;;  %1950 = vst.msk [vmem:[%s4093_s1 + $0x3] ss:$16 sm:$0xc] %vm142_vm1, %v521_v63  }
  0xa7   :  { %1951 = vst.msk [vmem:[%s4093_s1 + $0x3] ss:$16 sm:$0x30] %vm142_vm1, %v521_v63   ;;  %1952 = vst.msk [vmem:[%s4093_s1 + $0x3] ss:$16 sm:$0xc0] %vm142_vm1, %v521_v63   ;;  %1498 = vrot.lane.b32.xlu0 %v2379_v35, %s2280_s27  ;;  %1515 = vrot.lane.b32.xlu1 %v2387_v40, %s2280_s27 }
  0xa8   :  { %1953 = vst.msk [vmem:[%s4093_s1 + $0x83] ss:$16 sm:$0x3] %vm142_vm1, %v538_v0   ;;  %1954 = vst.msk [vmem:[%s4093_s1 + $0x83] ss:$16 sm:$0xc] %vm142_vm1, %v538_v0  }
  0xa9   :  { %1955 = vst.msk [vmem:[%s4093_s1 + $0x83] ss:$16 sm:$0x30] %vm142_vm1, %v538_v0   ;;  %1956 = vst.msk [vmem:[%s4093_s1 + $0x83] ss:$16 sm:$0xc0] %vm142_vm1, %v538_v0   ;;  %v555_v1 = vpop.permute.xlu0 %554   ;;  %v572_v2 = vpop.permute.xlu1 %571  }
  0xaa   :  { %1957 = vst.msk [vmem:[%s4093_s1 + $0x103] ss:$16 sm:$0x3] %vm142_vm1, %v555_v1   ;;  %1958 = vst.msk [vmem:[%s4093_s1 + $0x103] ss:$16 sm:$0xc] %vm142_vm1, %v555_v1  }
  0xab   :  { %1959 = vst.msk [vmem:[%s4093_s1 + $0x103] ss:$16 sm:$0x30] %vm142_vm1, %v555_v1   ;;  %1960 = vst.msk [vmem:[%s4093_s1 + $0x103] ss:$16 sm:$0xc0] %vm142_vm1, %v555_v1   ;;  %1532 = vrot.lane.b32.xlu0 %v2393_v42, %s2280_s27  ;;  %1549 = vrot.lane.b32.xlu1 %v2398_v45, %s2280_s27  ;;  %v1801_v1 = vsel %vm282_vm0, %v1799_v50, %v1797_v49 }
  0xac   :  { %1961 = vst.msk [vmem:[%s4093_s1 + $0x183] ss:$16 sm:$0x3] %vm142_vm1, %v572_v2   ;;  %1962 = vst.msk [vmem:[%s4093_s1 + $0x183] ss:$16 sm:$0xc] %vm142_vm1, %v572_v2  }
  0xad   :  { %1963 = vst.msk [vmem:[%s4093_s1 + $0x183] ss:$16 sm:$0x30] %vm142_vm1, %v572_v2   ;;  %1964 = vst.msk [vmem:[%s4093_s1 + $0x183] ss:$16 sm:$0xc0] %vm142_vm1, %v572_v2   ;;  %v589_v3 = vpop.permute.xlu0 %588   ;;  %v606_v4 = vpop.permute.xlu1 %605  }
  0xae   :  { %1965 = vst.msk [vmem:[%s4093_s1 + $0x203] ss:$16 sm:$0x3] %vm142_vm1, %v589_v3   ;;  %1966 = vst.msk [vmem:[%s4093_s1 + $0x203] ss:$16 sm:$0xc] %vm142_vm1, %v589_v3  }
  0xaf   :  { %1967 = vst.msk [vmem:[%s4093_s1 + $0x203] ss:$16 sm:$0x30] %vm142_vm1, %v589_v3   ;;  %1968 = vst.msk [vmem:[%s4093_s1 + $0x203] ss:$16 sm:$0xc0] %vm142_vm1, %v589_v3   ;;  %1566 = vrot.lane.b32.xlu0 %v2402_v48, %s2280_s27  ;;  %1582 = vrot.lane.b32.xlu1 %v2369_v27, %s2281_s24 }
  0xb0   :  { %1969 = vst.msk [vmem:[%s4093_s1 + $0x283] ss:$16 sm:$0x3] %vm142_vm1, %v606_v4   ;;  %1970 = vst.msk [vmem:[%s4093_s1 + $0x283] ss:$16 sm:$0xc] %vm142_vm1, %v606_v4  }
  0xb1   :  { %1971 = vst.msk [vmem:[%s4093_s1 + $0x283] ss:$16 sm:$0x30] %vm142_vm1, %v606_v4   ;;  %1972 = vst.msk [vmem:[%s4093_s1 + $0x283] ss:$16 sm:$0xc0] %vm142_vm1, %v606_v4   ;;  %v623_v5 = vpop.permute.xlu0 %622   ;;  %v639_v6 = vpop.permute.xlu1 %638  }
  0xb2   :  { %1973 = vst.msk [vmem:[%s4093_s1 + $0x303] ss:$16 sm:$0x3] %vm142_vm1, %v623_v5   ;;  %1974 = vst.msk [vmem:[%s4093_s1 + $0x303] ss:$16 sm:$0xc] %vm142_vm1, %v623_v5  }
  0xb3   :  { %1975 = vst.msk [vmem:[%s4093_s1 + $0x303] ss:$16 sm:$0x30] %vm142_vm1, %v623_v5   ;;  %1976 = vst.msk [vmem:[%s4093_s1 + $0x303] ss:$16 sm:$0xc0] %vm142_vm1, %v623_v5   ;;  %1599 = vrot.lane.b32.xlu0 %v2376_v32, %s2281_s24  ;;  %1616 = vrot.lane.b32.xlu1 %v2379_v35, %s2281_s24 }
  0xb4   :  { %1977 = vst.msk [vmem:[%s4093_s1 + $0x4] ss:$16 sm:$0x3] %vm142_vm1, %v639_v6   ;;  %1978 = vst.msk [vmem:[%s4093_s1 + $0x4] ss:$16 sm:$0xc] %vm142_vm1, %v639_v6  }
  0xb5   :  { %1979 = vst.msk [vmem:[%s4093_s1 + $0x4] ss:$16 sm:$0x30] %vm142_vm1, %v639_v6   ;;  %1980 = vst.msk [vmem:[%s4093_s1 + $0x4] ss:$16 sm:$0xc0] %vm142_vm1, %v639_v6   ;;  %v656_v7 = vpop.permute.xlu0 %655   ;;  %v673_v8 = vpop.permute.xlu1 %672  }
  0xb6   :  { %1981 = vst.msk [vmem:[%s4093_s1 + $0x84] ss:$16 sm:$0x3] %vm142_vm1, %v656_v7   ;;  %1982 = vst.msk [vmem:[%s4093_s1 + $0x84] ss:$16 sm:$0xc] %vm142_vm1, %v656_v7  }
  0xb7   :  { %1983 = vst.msk [vmem:[%s4093_s1 + $0x84] ss:$16 sm:$0x30] %vm142_vm1, %v656_v7   ;;  %1984 = vst.msk [vmem:[%s4093_s1 + $0x84] ss:$16 sm:$0xc0] %vm142_vm1, %v656_v7   ;;  %1633 = vrot.lane.b32.xlu0 %v2387_v40, %s2281_s24  ;;  %1650 = vrot.lane.b32.xlu1 %v2393_v42, %s2281_s24 }
  0xb8   :  { %1985 = vst.msk [vmem:[%s4093_s1 + $0x104] ss:$16 sm:$0x3] %vm142_vm1, %v673_v8   ;;  %1986 = vst.msk [vmem:[%s4093_s1 + $0x104] ss:$16 sm:$0xc] %vm142_vm1, %v673_v8  }
  0xb9   :  { %1987 = vst.msk [vmem:[%s4093_s1 + $0x104] ss:$16 sm:$0x30] %vm142_vm1, %v673_v8   ;;  %1988 = vst.msk [vmem:[%s4093_s1 + $0x104] ss:$16 sm:$0xc0] %vm142_vm1, %v673_v8   ;;  %v690_v10 = vpop.permute.xlu0 %689   ;;  %v707_v12 = vpop.permute.xlu1 %706  }
  0xba   :  { %1989 = vst.msk [vmem:[%s4093_s1 + $0x184] ss:$16 sm:$0x3] %vm142_vm1, %v690_v10   ;;  %1990 = vst.msk [vmem:[%s4093_s1 + $0x184] ss:$16 sm:$0xc] %vm142_vm1, %v690_v10  }
  0xbb   :  { %1991 = vst.msk [vmem:[%s4093_s1 + $0x184] ss:$16 sm:$0x30] %vm142_vm1, %v690_v10   ;;  %1992 = vst.msk [vmem:[%s4093_s1 + $0x184] ss:$16 sm:$0xc0] %vm142_vm1, %v690_v10   ;;  %1667 = vrot.lane.b32.xlu0 %v2398_v45, %s2281_s24  ;;  %1684 = vrot.lane.b32.xlu1 %v2402_v48, %s2281_s24 }
  0xbc   :  { %1993 = vst.msk [vmem:[%s4093_s1 + $0x204] ss:$16 sm:$0x3] %vm142_vm1, %v707_v12   ;;  %1994 = vst.msk [vmem:[%s4093_s1 + $0x204] ss:$16 sm:$0xc] %vm142_vm1, %v707_v12  }
  0xbd   :  { %1995 = vst.msk [vmem:[%s4093_s1 + $0x204] ss:$16 sm:$0x30] %vm142_vm1, %v707_v12   ;;  %1996 = vst.msk [vmem:[%s4093_s1 + $0x204] ss:$16 sm:$0xc0] %vm142_vm1, %v707_v12   ;;  %v724_v20 = vpop.permute.xlu0 %723   ;;  %v741_v25 = vpop.permute.xlu1 %740  }
  0xbe   :  { %1997 = vst.msk [vmem:[%s4093_s1 + $0x284] ss:$16 sm:$0x3] %vm142_vm1, %v724_v20   ;;  %1998 = vst.msk [vmem:[%s4093_s1 + $0x284] ss:$16 sm:$0xc] %vm142_vm1, %v724_v20  }
  0xbf   :  { %1999 = vst.msk [vmem:[%s4093_s1 + $0x284] ss:$16 sm:$0x30] %vm142_vm1, %v724_v20   ;;  %2000 = vst.msk [vmem:[%s4093_s1 + $0x284] ss:$16 sm:$0xc0] %vm142_vm1, %v724_v20   ;;  %1700 = vrot.lane.b32.xlu0 %v1699_v17, %s2282_s29  ;;  %1717 = vrot.lane.b32.xlu1 %v1716_v21, %s2282_s29 }
  0xc0   :  { %v160_v27 = vld [vmem:[#allocation0 + $0x20] sm:$0x3]   ;;  %2001 = vst.msk [vmem:[%s4093_s1 + $0x304] ss:$16 sm:$0x3] %vm142_vm1, %v741_v25  }
  0xc1   :  { %2002 = vst.msk [vmem:[%s4093_s1 + $0x304] ss:$16 sm:$0xc] %vm142_vm1, %v741_v25   ;;  %2003 = vst.msk [vmem:[%s4093_s1 + $0x304] ss:$16 sm:$0x30] %vm142_vm1, %v741_v25   ;;  %v757_v40 = vpop.permute.xlu0 %756   ;;  %v774_v45 = vpop.permute.xlu1 %773  }
  0xc2   :  { %2004 = vst.msk [vmem:[%s4093_s1 + $0x304] ss:$16 sm:$0xc0] %vm142_vm1, %v741_v25   ;;  %1869 = vst.msk [vmem:[%s4093_s1 + $0x80] ss:$16 sm:$0x3] %vm142_vm1, %v160_v27  }
  0xc3   :  { %v175_v32 = vld [vmem:[#allocation0 + $0x38] sm:$0x3]   ;;  %v1780_v35 = vld.sshfl [vmem:[#allocation0 + $0xa0] sm:$0xff pattern:$0x99999810]   ;;  %1734 = vrot.lane.b32.xlu0 %v1733_v34, %s2282_s29  ;;  %1751 = vrot.lane.b32.xlu1 %v1750_v41, %s2282_s29 }
  0xc4   :  { %1872 = vst.msk [vmem:[%s4093_s1 + $0xe0] ss:$16 sm:$0x3] %vm142_vm1, %v175_v32   ;;  %v200_v42 = vld [vmem:[#allocation0 + $0x60] sm:$0x3]   ;;  %v1784_v59 = vsel %vm282_vm0, %v1782_v36, %v1780_v35 }
  0xc5   :  { %2005 = vst.msk [vmem:[%s4093_s1 + $0x5] ss:$16 sm:$0x3] %vm142_vm1, %v757_v40   ;;  %2006 = vst.msk [vmem:[%s4093_s1 + $0x5] ss:$16 sm:$0xc] %vm142_vm1, %v757_v40   ;;  %v791_v58 = vpop.permute.xlu0 %790   ;;  %v808_v63 = vpop.permute.xlu1 %807  }
  0xc6   :  { %2007 = vst.msk [vmem:[%s4093_s1 + $0x5] ss:$16 sm:$0x30] %vm142_vm1, %v757_v40   ;;  %2008 = vst.msk [vmem:[%s4093_s1 + $0x5] ss:$16 sm:$0xc0] %vm142_vm1, %v757_v40  }
  0xc7   :  { %1877 = vst.msk [vmem:[%s4093_s1 + $0x180] ss:$16 sm:$0x3] %vm142_vm1, %v200_v42   ;;  %v225_v48 = vld [vmem:[#allocation0 + $0x88] sm:$0x3]   ;;  %1768 = vrot.lane.b32.xlu0 %v1767_v54, %s2282_s29  ;;  %1785 = vrot.lane.b32.xlu1 %v1784_v59, %s2282_s29 }
  0xc8   :  { %2009 = vst.msk [vmem:[%s4093_s1 + $0x85] ss:$16 sm:$0x3] %vm142_vm1, %v774_v45   ;;  %2010 = vst.msk [vmem:[%s4093_s1 + $0x85] ss:$16 sm:$0xc] %vm142_vm1, %v774_v45  }
  0xc9   :  { %2011 = vst.msk [vmem:[%s4093_s1 + $0x85] ss:$16 sm:$0x30] %vm142_vm1, %v774_v45   ;;  %2012 = vst.msk [vmem:[%s4093_s1 + $0x85] ss:$16 sm:$0xc0] %vm142_vm1, %v774_v45   ;;  %v825_v2 = vpop.permute.xlu0 %824   ;;  %v842_v3 = vpop.permute.xlu1 %841  }
  0xca   :  { %1882 = vst.msk [vmem:[%s4093_s1 + $0x220] ss:$16 sm:$0x3] %vm142_vm1, %v225_v48   ;;  %1883 = vst.msk [vmem:[%s4093_s1 + $0x240] ss:$16 sm:$0x3] %vm142_vm1, %v230_v51  }
  0xcb   :  { %1884 = vst.msk [vmem:[%s4093_s1 + $0x260] ss:$16 sm:$0x3] %vm142_vm1, %v235_v52   ;;  %1885 = vst.msk [vmem:[%s4093_s1 + $0x280] ss:$16 sm:$0x3] %vm142_vm1, %v240_v53   ;;  %1802 = vrot.lane.b32.xlu0 %v1801_v1, %s2282_s29 }
  0xcc   :  { %v245_v55 = vld [vmem:[#allocation0 + $0xa8] sm:$0x3]   ;;  %v250_v56 = vld [vmem:[#allocation0 + $0xb0] sm:$0x3]   ;;  %v255_v57 = vld [vmem:[#allocation0 + $0xb8] sm:$0x3]  }
  0xcd   :  { %1886 = vst.msk [vmem:[%s4093_s1 + $0x2a0] ss:$16 sm:$0x3] %vm142_vm1, %v245_v55   ;;  %1887 = vst.msk [vmem:[%s4093_s1 + $0x2c0] ss:$16 sm:$0x3] %vm142_vm1, %v250_v56   ;;  %v859_v4 = vpop.permute.xlu0 %858   ;;  %v875_v5 = vpop.permute.xlu1 %874  }
  0xce   :  { %1888 = vst.msk [vmem:[%s4093_s1 + $0x2e0] ss:$16 sm:$0x3] %vm142_vm1, %v255_v57   ;;  %v260_v60 = vld [vmem:[#allocation0 + $0xc0] sm:$0x3]  }
  0xcf   :  { %v265_v61 = vld [vmem:[#allocation0 + $0xc8] sm:$0x3]   ;;  %v270_v62 = vld [vmem:[#allocation0 + $0xd0] sm:$0x3]   ;;  %v275_v0 = vld [vmem:[#allocation0 + $0xd8] sm:$0x3]  }
  0xd0   :  { %2013 = vst.msk [vmem:[%s4093_s1 + $0x105] ss:$16 sm:$0x3] %vm142_vm1, %v791_v58   ;;  %2014 = vst.msk [vmem:[%s4093_s1 + $0x105] ss:$16 sm:$0xc] %vm142_vm1, %v791_v58  }
  0xd1   :  { %2015 = vst.msk [vmem:[%s4093_s1 + $0x105] ss:$16 sm:$0x30] %vm142_vm1, %v791_v58   ;;  %2016 = vst.msk [vmem:[%s4093_s1 + $0x105] ss:$16 sm:$0xc0] %vm142_vm1, %v791_v58   ;;  %v892_v6 = vpop.permute.xlu0 %891   ;;  %v909_v7 = vpop.permute.xlu1 %908  }
  0xd2   :  { %1889 = vst.msk [vmem:[%s4093_s1 + $0x300] ss:$16 sm:$0x3] %vm142_vm1, %v260_v60   ;;  %1890 = vst.msk [vmem:[%s4093_s1 + $0x320] ss:$16 sm:$0x3] %vm142_vm1, %v265_v61  }
  0xd3   :  { %1891 = vst.msk [vmem:[%s4093_s1 + $0x340] ss:$16 sm:$0x3] %vm142_vm1, %v270_v62   ;;  %2017 = vst.msk [vmem:[%s4093_s1 + $0x185] ss:$16 sm:$0x3] %vm142_vm1, %v808_v63  }
  0xd4   :  { %2018 = vst.msk [vmem:[%s4093_s1 + $0x185] ss:$16 sm:$0xc] %vm142_vm1, %v808_v63   ;;  %2019 = vst.msk [vmem:[%s4093_s1 + $0x185] ss:$16 sm:$0x30] %vm142_vm1, %v808_v63  }
  0xd5   :  { %2020 = vst.msk [vmem:[%s4093_s1 + $0x185] ss:$16 sm:$0xc0] %vm142_vm1, %v808_v63   ;;  %1892 = vst.msk [vmem:[%s4093_s1 + $0x360] ss:$16 sm:$0x3] %vm142_vm1, %v275_v0   ;;  %v926_v8 = vpop.permute.xlu0 %925   ;;  %v943_v9 = vpop.permute.xlu1 %942  }
  0xd6   :  { %2021 = vst.msk [vmem:[%s4093_s1 + $0x205] ss:$16 sm:$0x3] %vm142_vm1, %v825_v2   ;;  %2022 = vst.msk [vmem:[%s4093_s1 + $0x205] ss:$16 sm:$0xc] %vm142_vm1, %v825_v2  }
  0xd7   :  { %2023 = vst.msk [vmem:[%s4093_s1 + $0x205] ss:$16 sm:$0x30] %vm142_vm1, %v825_v2   ;;  %2024 = vst.msk [vmem:[%s4093_s1 + $0x205] ss:$16 sm:$0xc0] %vm142_vm1, %v825_v2  }
  0xd8   :  { %2025 = vst.msk [vmem:[%s4093_s1 + $0x285] ss:$16 sm:$0x3] %vm142_vm1, %v842_v3   ;;  %2026 = vst.msk [vmem:[%s4093_s1 + $0x285] ss:$16 sm:$0xc] %vm142_vm1, %v842_v3  }
  0xd9   :  { %2027 = vst.msk [vmem:[%s4093_s1 + $0x285] ss:$16 sm:$0x30] %vm142_vm1, %v842_v3   ;;  %2028 = vst.msk [vmem:[%s4093_s1 + $0x285] ss:$16 sm:$0xc0] %vm142_vm1, %v842_v3   ;;  %v960_v10 = vpop.permute.xlu0 %959   ;;  %v977_v11 = vpop.permute.xlu1 %976  }
  0xda   :  { %2029 = vst.msk [vmem:[%s4093_s1 + $0x305] ss:$16 sm:$0x3] %vm142_vm1, %v859_v4   ;;  %2030 = vst.msk [vmem:[%s4093_s1 + $0x305] ss:$16 sm:$0xc] %vm142_vm1, %v859_v4  }
  0xdb   :  { %2031 = vst.msk [vmem:[%s4093_s1 + $0x305] ss:$16 sm:$0x30] %vm142_vm1, %v859_v4   ;;  %2032 = vst.msk [vmem:[%s4093_s1 + $0x305] ss:$16 sm:$0xc0] %vm142_vm1, %v859_v4  }
  0xdc   :  { %2033 = vst.msk [vmem:[%s4093_s1 + $0x6] ss:$16 sm:$0x3] %vm142_vm1, %v875_v5   ;;  %2034 = vst.msk [vmem:[%s4093_s1 + $0x6] ss:$16 sm:$0xc] %vm142_vm1, %v875_v5  }
  0xdd   :  { %2035 = vst.msk [vmem:[%s4093_s1 + $0x6] ss:$16 sm:$0x30] %vm142_vm1, %v875_v5   ;;  %2036 = vst.msk [vmem:[%s4093_s1 + $0x6] ss:$16 sm:$0xc0] %vm142_vm1, %v875_v5   ;;  %v993_v12 = vpop.permute.xlu0 %992   ;;  %v1010_v13 = vpop.permute.xlu1 %1009  }
  0xde   :  { %2037 = vst.msk [vmem:[%s4093_s1 + $0x86] ss:$16 sm:$0x3] %vm142_vm1, %v892_v6   ;;  %2038 = vst.msk [vmem:[%s4093_s1 + $0x86] ss:$16 sm:$0xc] %vm142_vm1, %v892_v6  }
  0xdf   :  { %2039 = vst.msk [vmem:[%s4093_s1 + $0x86] ss:$16 sm:$0x30] %vm142_vm1, %v892_v6   ;;  %2040 = vst.msk [vmem:[%s4093_s1 + $0x86] ss:$16 sm:$0xc0] %vm142_vm1, %v892_v6  }
  0xe0   :  { %2041 = vst.msk [vmem:[%s4093_s1 + $0x106] ss:$16 sm:$0x3] %vm142_vm1, %v909_v7   ;;  %2042 = vst.msk [vmem:[%s4093_s1 + $0x106] ss:$16 sm:$0xc] %vm142_vm1, %v909_v7  }
  0xe1   :  { %2043 = vst.msk [vmem:[%s4093_s1 + $0x106] ss:$16 sm:$0x30] %vm142_vm1, %v909_v7   ;;  %2044 = vst.msk [vmem:[%s4093_s1 + $0x106] ss:$16 sm:$0xc0] %vm142_vm1, %v909_v7   ;;  %v1027_v14 = vpop.permute.xlu0 %1026   ;;  %v1044_v15 = vpop.permute.xlu1 %1043  }
  0xe2   :  { %2045 = vst.msk [vmem:[%s4093_s1 + $0x186] ss:$16 sm:$0x3] %vm142_vm1, %v926_v8   ;;  %2046 = vst.msk [vmem:[%s4093_s1 + $0x186] ss:$16 sm:$0xc] %vm142_vm1, %v926_v8  }
  0xe3   :  { %2047 = vst.msk [vmem:[%s4093_s1 + $0x186] ss:$16 sm:$0x30] %vm142_vm1, %v926_v8   ;;  %2048 = vst.msk [vmem:[%s4093_s1 + $0x186] ss:$16 sm:$0xc0] %vm142_vm1, %v926_v8  }
  0xe4   :  { %2049 = vst.msk [vmem:[%s4093_s1 + $0x206] ss:$16 sm:$0x3] %vm142_vm1, %v943_v9   ;;  %2050 = vst.msk [vmem:[%s4093_s1 + $0x206] ss:$16 sm:$0xc] %vm142_vm1, %v943_v9  }
  0xe5   :  { %2051 = vst.msk [vmem:[%s4093_s1 + $0x206] ss:$16 sm:$0x30] %vm142_vm1, %v943_v9   ;;  %2052 = vst.msk [vmem:[%s4093_s1 + $0x206] ss:$16 sm:$0xc0] %vm142_vm1, %v943_v9   ;;  %v1061_v16 = vpop.permute.xlu0 %1060   ;;  %v1078_v17 = vpop.permute.xlu1 %1077  }
  0xe6   :  { %2053 = vst.msk [vmem:[%s4093_s1 + $0x286] ss:$16 sm:$0x3] %vm142_vm1, %v960_v10   ;;  %2054 = vst.msk [vmem:[%s4093_s1 + $0x286] ss:$16 sm:$0xc] %vm142_vm1, %v960_v10  }
  0xe7   :  { %2055 = vst.msk [vmem:[%s4093_s1 + $0x286] ss:$16 sm:$0x30] %vm142_vm1, %v960_v10   ;;  %2056 = vst.msk [vmem:[%s4093_s1 + $0x286] ss:$16 sm:$0xc0] %vm142_vm1, %v960_v10  }
  0xe8   :  { %2057 = vst.msk [vmem:[%s4093_s1 + $0x306] ss:$16 sm:$0x3] %vm142_vm1, %v977_v11   ;;  %2058 = vst.msk [vmem:[%s4093_s1 + $0x306] ss:$16 sm:$0xc] %vm142_vm1, %v977_v11  }
  0xe9   :  { %2059 = vst.msk [vmem:[%s4093_s1 + $0x306] ss:$16 sm:$0x30] %vm142_vm1, %v977_v11   ;;  %2060 = vst.msk [vmem:[%s4093_s1 + $0x306] ss:$16 sm:$0xc0] %vm142_vm1, %v977_v11   ;;  %v1095_v18 = vpop.permute.xlu0 %1094   ;;  %v1111_v19 = vpop.permute.xlu1 %1110  }
  0xea   :  { %2061 = vst.msk [vmem:[%s4093_s1 + $0x7] ss:$16 sm:$0x3] %vm142_vm1, %v993_v12   ;;  %2062 = vst.msk [vmem:[%s4093_s1 + $0x7] ss:$16 sm:$0xc] %vm142_vm1, %v993_v12  }
  0xeb   :  { %2063 = vst.msk [vmem:[%s4093_s1 + $0x7] ss:$16 sm:$0x30] %vm142_vm1, %v993_v12   ;;  %2064 = vst.msk [vmem:[%s4093_s1 + $0x7] ss:$16 sm:$0xc0] %vm142_vm1, %v993_v12  }
  0xec   :  { %2065 = vst.msk [vmem:[%s4093_s1 + $0x87] ss:$16 sm:$0x3] %vm142_vm1, %v1010_v13   ;;  %2066 = vst.msk [vmem:[%s4093_s1 + $0x87] ss:$16 sm:$0xc] %vm142_vm1, %v1010_v13  }
  0xed   :  { %2067 = vst.msk [vmem:[%s4093_s1 + $0x87] ss:$16 sm:$0x30] %vm142_vm1, %v1010_v13   ;;  %2068 = vst.msk [vmem:[%s4093_s1 + $0x87] ss:$16 sm:$0xc0] %vm142_vm1, %v1010_v13   ;;  %v1128_v20 = vpop.permute.xlu0 %1127   ;;  %v1145_v21 = vpop.permute.xlu1 %1144  }
  0xee   :  { %2069 = vst.msk [vmem:[%s4093_s1 + $0x107] ss:$16 sm:$0x3] %vm142_vm1, %v1027_v14   ;;  %2070 = vst.msk [vmem:[%s4093_s1 + $0x107] ss:$16 sm:$0xc] %vm142_vm1, %v1027_v14  }
  0xef   :  { %2071 = vst.msk [vmem:[%s4093_s1 + $0x107] ss:$16 sm:$0x30] %vm142_vm1, %v1027_v14   ;;  %2072 = vst.msk [vmem:[%s4093_s1 + $0x107] ss:$16 sm:$0xc0] %vm142_vm1, %v1027_v14  }
  0xf0   :  { %2073 = vst.msk [vmem:[%s4093_s1 + $0x187] ss:$16 sm:$0x3] %vm142_vm1, %v1044_v15   ;;  %2074 = vst.msk [vmem:[%s4093_s1 + $0x187] ss:$16 sm:$0xc] %vm142_vm1, %v1044_v15  }
  0xf1   :  { %2075 = vst.msk [vmem:[%s4093_s1 + $0x187] ss:$16 sm:$0x30] %vm142_vm1, %v1044_v15   ;;  %2076 = vst.msk [vmem:[%s4093_s1 + $0x187] ss:$16 sm:$0xc0] %vm142_vm1, %v1044_v15   ;;  %v1162_v22 = vpop.permute.xlu0 %1161   ;;  %v1179_v23 = vpop.permute.xlu1 %1178  }
  0xf2   :  { %2077 = vst.msk [vmem:[%s4093_s1 + $0x207] ss:$16 sm:$0x3] %vm142_vm1, %v1061_v16   ;;  %2078 = vst.msk [vmem:[%s4093_s1 + $0x207] ss:$16 sm:$0xc] %vm142_vm1, %v1061_v16  }
  0xf3   :  { %2079 = vst.msk [vmem:[%s4093_s1 + $0x207] ss:$16 sm:$0x30] %vm142_vm1, %v1061_v16   ;;  %2080 = vst.msk [vmem:[%s4093_s1 + $0x207] ss:$16 sm:$0xc0] %vm142_vm1, %v1061_v16  }
  0xf4   :  { %2081 = vst.msk [vmem:[%s4093_s1 + $0x287] ss:$16 sm:$0x3] %vm142_vm1, %v1078_v17   ;;  %2082 = vst.msk [vmem:[%s4093_s1 + $0x287] ss:$16 sm:$0xc] %vm142_vm1, %v1078_v17  }
  0xf5   :  { %2083 = vst.msk [vmem:[%s4093_s1 + $0x287] ss:$16 sm:$0x30] %vm142_vm1, %v1078_v17   ;;  %2084 = vst.msk [vmem:[%s4093_s1 + $0x287] ss:$16 sm:$0xc0] %vm142_vm1, %v1078_v17   ;;  %v1196_v24 = vpop.permute.xlu0 %1195   ;;  %v1213_v25 = vpop.permute.xlu1 %1212  }
  0xf6   :  { %2085 = vst.msk [vmem:[%s4093_s1 + $0x307] ss:$16 sm:$0x3] %vm142_vm1, %v1095_v18   ;;  %2086 = vst.msk [vmem:[%s4093_s1 + $0x307] ss:$16 sm:$0xc] %vm142_vm1, %v1095_v18  }
  0xf7   :  { %2087 = vst.msk [vmem:[%s4093_s1 + $0x307] ss:$16 sm:$0x30] %vm142_vm1, %v1095_v18   ;;  %2088 = vst.msk [vmem:[%s4093_s1 + $0x307] ss:$16 sm:$0xc0] %vm142_vm1, %v1095_v18  }
  0xf8   :  { %2089 = vst.msk [vmem:[%s4093_s1 + $0x8] ss:$16 sm:$0x3] %vm142_vm1, %v1111_v19   ;;  %2090 = vst.msk [vmem:[%s4093_s1 + $0x8] ss:$16 sm:$0xc] %vm142_vm1, %v1111_v19  }
  0xf9   :  { %2091 = vst.msk [vmem:[%s4093_s1 + $0x8] ss:$16 sm:$0x30] %vm142_vm1, %v1111_v19   ;;  %2092 = vst.msk [vmem:[%s4093_s1 + $0x8] ss:$16 sm:$0xc0] %vm142_vm1, %v1111_v19   ;;  %v1229_v26 = vpop.permute.xlu0 %1228   ;;  %v1246_v27 = vpop.permute.xlu1 %1245  }
  0xfa   :  { %2093 = vst.msk [vmem:[%s4093_s1 + $0x88] ss:$16 sm:$0x3] %vm142_vm1, %v1128_v20   ;;  %2094 = vst.msk [vmem:[%s4093_s1 + $0x88] ss:$16 sm:$0xc] %vm142_vm1, %v1128_v20  }
  0xfb   :  { %2095 = vst.msk [vmem:[%s4093_s1 + $0x88] ss:$16 sm:$0x30] %vm142_vm1, %v1128_v20   ;;  %2096 = vst.msk [vmem:[%s4093_s1 + $0x88] ss:$16 sm:$0xc0] %vm142_vm1, %v1128_v20  }
  0xfc   :  { %2097 = vst.msk [vmem:[%s4093_s1 + $0x108] ss:$16 sm:$0x3] %vm142_vm1, %v1145_v21   ;;  %2098 = vst.msk [vmem:[%s4093_s1 + $0x108] ss:$16 sm:$0xc] %vm142_vm1, %v1145_v21  }
  0xfd   :  { %2099 = vst.msk [vmem:[%s4093_s1 + $0x108] ss:$16 sm:$0x30] %vm142_vm1, %v1145_v21   ;;  %2100 = vst.msk [vmem:[%s4093_s1 + $0x108] ss:$16 sm:$0xc0] %vm142_vm1, %v1145_v21   ;;  %v1263_v28 = vpop.permute.xlu0 %1262   ;;  %v1280_v29 = vpop.permute.xlu1 %1279  }
  0xfe   :  { %2101 = vst.msk [vmem:[%s4093_s1 + $0x188] ss:$16 sm:$0x3] %vm142_vm1, %v1162_v22   ;;  %2102 = vst.msk [vmem:[%s4093_s1 + $0x188] ss:$16 sm:$0xc] %vm142_vm1, %v1162_v22  }
  0xff   :  { %2103 = vst.msk [vmem:[%s4093_s1 + $0x188] ss:$16 sm:$0x30] %vm142_vm1, %v1162_v22   ;;  %2104 = vst.msk [vmem:[%s4093_s1 + $0x188] ss:$16 sm:$0xc0] %vm142_vm1, %v1162_v22  }
 0x100   :  { %2105 = vst.msk [vmem:[%s4093_s1 + $0x208] ss:$16 sm:$0x3] %vm142_vm1, %v1179_v23   ;;  %2106 = vst.msk [vmem:[%s4093_s1 + $0x208] ss:$16 sm:$0xc] %vm142_vm1, %v1179_v23  }
 0x101   :  { %2107 = vst.msk [vmem:[%s4093_s1 + $0x208] ss:$16 sm:$0x30] %vm142_vm1, %v1179_v23   ;;  %2108 = vst.msk [vmem:[%s4093_s1 + $0x208] ss:$16 sm:$0xc0] %vm142_vm1, %v1179_v23   ;;  %v1297_v30 = vpop.permute.xlu0 %1296   ;;  %v1314_v31 = vpop.permute.xlu1 %1313  }
 0x102   :  { %2109 = vst.msk [vmem:[%s4093_s1 + $0x288] ss:$16 sm:$0x3] %vm142_vm1, %v1196_v24   ;;  %2110 = vst.msk [vmem:[%s4093_s1 + $0x288] ss:$16 sm:$0xc] %vm142_vm1, %v1196_v24  }
 0x103   :  { %2111 = vst.msk [vmem:[%s4093_s1 + $0x288] ss:$16 sm:$0x30] %vm142_vm1, %v1196_v24   ;;  %2112 = vst.msk [vmem:[%s4093_s1 + $0x288] ss:$16 sm:$0xc0] %vm142_vm1, %v1196_v24  }
 0x104   :  { %2113 = vst.msk [vmem:[%s4093_s1 + $0x308] ss:$16 sm:$0x3] %vm142_vm1, %v1213_v25   ;;  %2114 = vst.msk [vmem:[%s4093_s1 + $0x308] ss:$16 sm:$0xc] %vm142_vm1, %v1213_v25  }
 0x105   :  { %2115 = vst.msk [vmem:[%s4093_s1 + $0x308] ss:$16 sm:$0x30] %vm142_vm1, %v1213_v25   ;;  %2116 = vst.msk [vmem:[%s4093_s1 + $0x308] ss:$16 sm:$0xc0] %vm142_vm1, %v1213_v25   ;;  %v1331_v32 = vpop.permute.xlu0 %1330   ;;  %v1347_v33 = vpop.permute.xlu1 %1346  }
 0x106   :  { %2117 = vst.msk [vmem:[%s4093_s1 + $0x9] ss:$16 sm:$0x3] %vm142_vm1, %v1229_v26   ;;  %2118 = vst.msk [vmem:[%s4093_s1 + $0x9] ss:$16 sm:$0xc] %vm142_vm1, %v1229_v26  }
 0x107   :  { %2119 = vst.msk [vmem:[%s4093_s1 + $0x9] ss:$16 sm:$0x30] %vm142_vm1, %v1229_v26   ;;  %2120 = vst.msk [vmem:[%s4093_s1 + $0x9] ss:$16 sm:$0xc0] %vm142_vm1, %v1229_v26  }
 0x108   :  { %2121 = vst.msk [vmem:[%s4093_s1 + $0x89] ss:$16 sm:$0x3] %vm142_vm1, %v1246_v27   ;;  %2122 = vst.msk [vmem:[%s4093_s1 + $0x89] ss:$16 sm:$0xc] %vm142_vm1, %v1246_v27  }
 0x109   :  { %2123 = vst.msk [vmem:[%s4093_s1 + $0x89] ss:$16 sm:$0x30] %vm142_vm1, %v1246_v27   ;;  %2124 = vst.msk [vmem:[%s4093_s1 + $0x89] ss:$16 sm:$0xc0] %vm142_vm1, %v1246_v27   ;;  %v1364_v34 = vpop.permute.xlu0 %1363   ;;  %v1381_v35 = vpop.permute.xlu1 %1380  }
 0x10a   :  { %2125 = vst.msk [vmem:[%s4093_s1 + $0x109] ss:$16 sm:$0x3] %vm142_vm1, %v1263_v28   ;;  %2126 = vst.msk [vmem:[%s4093_s1 + $0x109] ss:$16 sm:$0xc] %vm142_vm1, %v1263_v28  }
 0x10b   :  { %2127 = vst.msk [vmem:[%s4093_s1 + $0x109] ss:$16 sm:$0x30] %vm142_vm1, %v1263_v28   ;;  %2128 = vst.msk [vmem:[%s4093_s1 + $0x109] ss:$16 sm:$0xc0] %vm142_vm1, %v1263_v28  }
 0x10c   :  { %2129 = vst.msk [vmem:[%s4093_s1 + $0x189] ss:$16 sm:$0x3] %vm142_vm1, %v1280_v29   ;;  %2130 = vst.msk [vmem:[%s4093_s1 + $0x189] ss:$16 sm:$0xc] %vm142_vm1, %v1280_v29  }
 0x10d   :  { %2131 = vst.msk [vmem:[%s4093_s1 + $0x189] ss:$16 sm:$0x30] %vm142_vm1, %v1280_v29   ;;  %2132 = vst.msk [vmem:[%s4093_s1 + $0x189] ss:$16 sm:$0xc0] %vm142_vm1, %v1280_v29   ;;  %v1398_v36 = vpop.permute.xlu0 %1397   ;;  %v1415_v37 = vpop.permute.xlu1 %1414  }
 0x10e   :  { %2133 = vst.msk [vmem:[%s4093_s1 + $0x209] ss:$16 sm:$0x3] %vm142_vm1, %v1297_v30   ;;  %2134 = vst.msk [vmem:[%s4093_s1 + $0x209] ss:$16 sm:$0xc] %vm142_vm1, %v1297_v30  }
 0x10f   :  { %2135 = vst.msk [vmem:[%s4093_s1 + $0x209] ss:$16 sm:$0x30] %vm142_vm1, %v1297_v30   ;;  %2136 = vst.msk [vmem:[%s4093_s1 + $0x209] ss:$16 sm:$0xc0] %vm142_vm1, %v1297_v30  }
 0x110   :  { %2137 = vst.msk [vmem:[%s4093_s1 + $0x289] ss:$16 sm:$0x3] %vm142_vm1, %v1314_v31   ;;  %2138 = vst.msk [vmem:[%s4093_s1 + $0x289] ss:$16 sm:$0xc] %vm142_vm1, %v1314_v31  }
 0x111   :  { %2139 = vst.msk [vmem:[%s4093_s1 + $0x289] ss:$16 sm:$0x30] %vm142_vm1, %v1314_v31   ;;  %2140 = vst.msk [vmem:[%s4093_s1 + $0x289] ss:$16 sm:$0xc0] %vm142_vm1, %v1314_v31   ;;  %v1432_v38 = vpop.permute.xlu0 %1431   ;;  %v1449_v39 = vpop.permute.xlu1 %1448  }
 0x112   :  { %2141 = vst.msk [vmem:[%s4093_s1 + $0x309] ss:$16 sm:$0x3] %vm142_vm1, %v1331_v32   ;;  %2142 = vst.msk [vmem:[%s4093_s1 + $0x309] ss:$16 sm:$0xc] %vm142_vm1, %v1331_v32  }
 0x113   :  { %2143 = vst.msk [vmem:[%s4093_s1 + $0x309] ss:$16 sm:$0x30] %vm142_vm1, %v1331_v32   ;;  %2144 = vst.msk [vmem:[%s4093_s1 + $0x309] ss:$16 sm:$0xc0] %vm142_vm1, %v1331_v32  }
 0x114   :  { %2145 = vst.msk [vmem:[%s4093_s1 + $0xa] ss:$16 sm:$0x3] %vm142_vm1, %v1347_v33   ;;  %2146 = vst.msk [vmem:[%s4093_s1 + $0xa] ss:$16 sm:$0xc] %vm142_vm1, %v1347_v33  }
 0x115   :  { %2147 = vst.msk [vmem:[%s4093_s1 + $0xa] ss:$16 sm:$0x30] %vm142_vm1, %v1347_v33   ;;  %2148 = vst.msk [vmem:[%s4093_s1 + $0xa] ss:$16 sm:$0xc0] %vm142_vm1, %v1347_v33   ;;  %v1465_v40 = vpop.permute.xlu0 %1464   ;;  %v1482_v41 = vpop.permute.xlu1 %1481  }
 0x116   :  { %2149 = vst.msk [vmem:[%s4093_s1 + $0x8a] ss:$16 sm:$0x3] %vm142_vm1, %v1364_v34   ;;  %2150 = vst.msk [vmem:[%s4093_s1 + $0x8a] ss:$16 sm:$0xc] %vm142_vm1, %v1364_v34  }
 0x117   :  { %2151 = vst.msk [vmem:[%s4093_s1 + $0x8a] ss:$16 sm:$0x30] %vm142_vm1, %v1364_v34   ;;  %2152 = vst.msk [vmem:[%s4093_s1 + $0x8a] ss:$16 sm:$0xc0] %vm142_vm1, %v1364_v34  }
 0x118   :  { %2153 = vst.msk [vmem:[%s4093_s1 + $0x10a] ss:$16 sm:$0x3] %vm142_vm1, %v1381_v35   ;;  %2154 = vst.msk [vmem:[%s4093_s1 + $0x10a] ss:$16 sm:$0xc] %vm142_vm1, %v1381_v35  }
 0x119   :  { %2155 = vst.msk [vmem:[%s4093_s1 + $0x10a] ss:$16 sm:$0x30] %vm142_vm1, %v1381_v35   ;;  %2156 = vst.msk [vmem:[%s4093_s1 + $0x10a] ss:$16 sm:$0xc0] %vm142_vm1, %v1381_v35   ;;  %v1499_v42 = vpop.permute.xlu0 %1498   ;;  %v1516_v43 = vpop.permute.xlu1 %1515  }
 0x11a   :  { %2157 = vst.msk [vmem:[%s4093_s1 + $0x18a] ss:$16 sm:$0x3] %vm142_vm1, %v1398_v36   ;;  %2158 = vst.msk [vmem:[%s4093_s1 + $0x18a] ss:$16 sm:$0xc] %vm142_vm1, %v1398_v36  }
 0x11b   :  { %2159 = vst.msk [vmem:[%s4093_s1 + $0x18a] ss:$16 sm:$0x30] %vm142_vm1, %v1398_v36   ;;  %2160 = vst.msk [vmem:[%s4093_s1 + $0x18a] ss:$16 sm:$0xc0] %vm142_vm1, %v1398_v36  }
 0x11c   :  { %2161 = vst.msk [vmem:[%s4093_s1 + $0x20a] ss:$16 sm:$0x3] %vm142_vm1, %v1415_v37   ;;  %2162 = vst.msk [vmem:[%s4093_s1 + $0x20a] ss:$16 sm:$0xc] %vm142_vm1, %v1415_v37  }
 0x11d   :  { %2163 = vst.msk [vmem:[%s4093_s1 + $0x20a] ss:$16 sm:$0x30] %vm142_vm1, %v1415_v37   ;;  %2164 = vst.msk [vmem:[%s4093_s1 + $0x20a] ss:$16 sm:$0xc0] %vm142_vm1, %v1415_v37   ;;  %v1533_v44 = vpop.permute.xlu0 %1532   ;;  %v1550_v45 = vpop.permute.xlu1 %1549  }
 0x11e   :  { %2165 = vst.msk [vmem:[%s4093_s1 + $0x28a] ss:$16 sm:$0x3] %vm142_vm1, %v1432_v38   ;;  %2166 = vst.msk [vmem:[%s4093_s1 + $0x28a] ss:$16 sm:$0xc] %vm142_vm1, %v1432_v38  }
 0x11f   :  { %2167 = vst.msk [vmem:[%s4093_s1 + $0x28a] ss:$16 sm:$0x30] %vm142_vm1, %v1432_v38   ;;  %2168 = vst.msk [vmem:[%s4093_s1 + $0x28a] ss:$16 sm:$0xc0] %vm142_vm1, %v1432_v38  }
 0x120   :  { %2169 = vst.msk [vmem:[%s4093_s1 + $0x30a] ss:$16 sm:$0x3] %vm142_vm1, %v1449_v39   ;;  %2170 = vst.msk [vmem:[%s4093_s1 + $0x30a] ss:$16 sm:$0xc] %vm142_vm1, %v1449_v39  }
 0x121   :  { %2171 = vst.msk [vmem:[%s4093_s1 + $0x30a] ss:$16 sm:$0x30] %vm142_vm1, %v1449_v39   ;;  %2172 = vst.msk [vmem:[%s4093_s1 + $0x30a] ss:$16 sm:$0xc0] %vm142_vm1, %v1449_v39   ;;  %v1567_v46 = vpop.permute.xlu0 %1566   ;;  %v1583_v47 = vpop.permute.xlu1 %1582  }
 0x122   :  { %2173 = vst.msk [vmem:[%s4093_s1 + $0xb] ss:$16 sm:$0x3] %vm142_vm1, %v1465_v40   ;;  %2174 = vst.msk [vmem:[%s4093_s1 + $0xb] ss:$16 sm:$0xc] %vm142_vm1, %v1465_v40  }
 0x123   :  { %2175 = vst.msk [vmem:[%s4093_s1 + $0xb] ss:$16 sm:$0x30] %vm142_vm1, %v1465_v40   ;;  %2176 = vst.msk [vmem:[%s4093_s1 + $0xb] ss:$16 sm:$0xc0] %vm142_vm1, %v1465_v40  }
 0x124   :  { %2177 = vst.msk [vmem:[%s4093_s1 + $0x8b] ss:$16 sm:$0x3] %vm142_vm1, %v1482_v41   ;;  %2178 = vst.msk [vmem:[%s4093_s1 + $0x8b] ss:$16 sm:$0xc] %vm142_vm1, %v1482_v41  }
 0x125   :  { %2179 = vst.msk [vmem:[%s4093_s1 + $0x8b] ss:$16 sm:$0x30] %vm142_vm1, %v1482_v41   ;;  %2180 = vst.msk [vmem:[%s4093_s1 + $0x8b] ss:$16 sm:$0xc0] %vm142_vm1, %v1482_v41   ;;  %v1600_v48 = vpop.permute.xlu0 %1599   ;;  %v1617_v49 = vpop.permute.xlu1 %1616  }
 0x126   :  { %2181 = vst.msk [vmem:[%s4093_s1 + $0x10b] ss:$16 sm:$0x3] %vm142_vm1, %v1499_v42   ;;  %2182 = vst.msk [vmem:[%s4093_s1 + $0x10b] ss:$16 sm:$0xc] %vm142_vm1, %v1499_v42  }
 0x127   :  { %2183 = vst.msk [vmem:[%s4093_s1 + $0x10b] ss:$16 sm:$0x30] %vm142_vm1, %v1499_v42   ;;  %2184 = vst.msk [vmem:[%s4093_s1 + $0x10b] ss:$16 sm:$0xc0] %vm142_vm1, %v1499_v42  }
 0x128   :  { %2185 = vst.msk [vmem:[%s4093_s1 + $0x18b] ss:$16 sm:$0x3] %vm142_vm1, %v1516_v43   ;;  %2186 = vst.msk [vmem:[%s4093_s1 + $0x18b] ss:$16 sm:$0xc] %vm142_vm1, %v1516_v43  }
 0x129   :  { %2187 = vst.msk [vmem:[%s4093_s1 + $0x18b] ss:$16 sm:$0x30] %vm142_vm1, %v1516_v43   ;;  %2188 = vst.msk [vmem:[%s4093_s1 + $0x18b] ss:$16 sm:$0xc0] %vm142_vm1, %v1516_v43   ;;  %v1634_v50 = vpop.permute.xlu0 %1633   ;;  %v1651_v51 = vpop.permute.xlu1 %1650  }
 0x12a   :  { %2189 = vst.msk [vmem:[%s4093_s1 + $0x20b] ss:$16 sm:$0x3] %vm142_vm1, %v1533_v44   ;;  %2190 = vst.msk [vmem:[%s4093_s1 + $0x20b] ss:$16 sm:$0xc] %vm142_vm1, %v1533_v44  }
 0x12b   :  { %2191 = vst.msk [vmem:[%s4093_s1 + $0x20b] ss:$16 sm:$0x30] %vm142_vm1, %v1533_v44   ;;  %2192 = vst.msk [vmem:[%s4093_s1 + $0x20b] ss:$16 sm:$0xc0] %vm142_vm1, %v1533_v44  }
 0x12c   :  { %2193 = vst.msk [vmem:[%s4093_s1 + $0x28b] ss:$16 sm:$0x3] %vm142_vm1, %v1550_v45   ;;  %2194 = vst.msk [vmem:[%s4093_s1 + $0x28b] ss:$16 sm:$0xc] %vm142_vm1, %v1550_v45  }
 0x12d   :  { %2195 = vst.msk [vmem:[%s4093_s1 + $0x28b] ss:$16 sm:$0x30] %vm142_vm1, %v1550_v45   ;;  %2196 = vst.msk [vmem:[%s4093_s1 + $0x28b] ss:$16 sm:$0xc0] %vm142_vm1, %v1550_v45   ;;  %v1668_v52 = vpop.permute.xlu0 %1667   ;;  %v1685_v53 = vpop.permute.xlu1 %1684  }
 0x12e   :  { %2197 = vst.msk [vmem:[%s4093_s1 + $0x30b] ss:$16 sm:$0x3] %vm142_vm1, %v1567_v46   ;;  %2198 = vst.msk [vmem:[%s4093_s1 + $0x30b] ss:$16 sm:$0xc] %vm142_vm1, %v1567_v46  }
 0x12f   :  { %2199 = vst.msk [vmem:[%s4093_s1 + $0x30b] ss:$16 sm:$0x30] %vm142_vm1, %v1567_v46   ;;  %2200 = vst.msk [vmem:[%s4093_s1 + $0x30b] ss:$16 sm:$0xc0] %vm142_vm1, %v1567_v46  }
 0x130   :  { %2201 = vst.msk [vmem:[%s4093_s1 + $0xc] ss:$16 sm:$0x3] %vm142_vm1, %v1583_v47   ;;  %2202 = vst.msk [vmem:[%s4093_s1 + $0xc] ss:$16 sm:$0xc] %vm142_vm1, %v1583_v47  }
 0x131   :  { %2203 = vst.msk [vmem:[%s4093_s1 + $0xc] ss:$16 sm:$0x30] %vm142_vm1, %v1583_v47   ;;  %2204 = vst.msk [vmem:[%s4093_s1 + $0xc] ss:$16 sm:$0xc0] %vm142_vm1, %v1583_v47   ;;  %v1701_v54 = vpop.permute.xlu0 %1700   ;;  %v1718_v55 = vpop.permute.xlu1 %1717  }
 0x132   :  { %2205 = vst.msk [vmem:[%s4093_s1 + $0x8c] ss:$16 sm:$0x3] %vm142_vm1, %v1600_v48   ;;  %2206 = vst.msk [vmem:[%s4093_s1 + $0x8c] ss:$16 sm:$0xc] %vm142_vm1, %v1600_v48  }
 0x133   :  { %2207 = vst.msk [vmem:[%s4093_s1 + $0x8c] ss:$16 sm:$0x30] %vm142_vm1, %v1600_v48   ;;  %2208 = vst.msk [vmem:[%s4093_s1 + $0x8c] ss:$16 sm:$0xc0] %vm142_vm1, %v1600_v48  }
 0x134   :  { %2209 = vst.msk [vmem:[%s4093_s1 + $0x10c] ss:$16 sm:$0x3] %vm142_vm1, %v1617_v49   ;;  %2210 = vst.msk [vmem:[%s4093_s1 + $0x10c] ss:$16 sm:$0xc] %vm142_vm1, %v1617_v49  }
 0x135   :  { %2211 = vst.msk [vmem:[%s4093_s1 + $0x10c] ss:$16 sm:$0x30] %vm142_vm1, %v1617_v49   ;;  %2212 = vst.msk [vmem:[%s4093_s1 + $0x10c] ss:$16 sm:$0xc0] %vm142_vm1, %v1617_v49   ;;  %v1735_v56 = vpop.permute.xlu0 %1734   ;;  %v1752_v57 = vpop.permute.xlu1 %1751  }
 0x136   :  { %2213 = vst.msk [vmem:[%s4093_s1 + $0x18c] ss:$16 sm:$0x3] %vm142_vm1, %v1634_v50   ;;  %2214 = vst.msk [vmem:[%s4093_s1 + $0x18c] ss:$16 sm:$0xc] %vm142_vm1, %v1634_v50  }
 0x137   :  { %2215 = vst.msk [vmem:[%s4093_s1 + $0x18c] ss:$16 sm:$0x30] %vm142_vm1, %v1634_v50   ;;  %2216 = vst.msk [vmem:[%s4093_s1 + $0x18c] ss:$16 sm:$0xc0] %vm142_vm1, %v1634_v50  }
 0x138   :  { %2217 = vst.msk [vmem:[%s4093_s1 + $0x20c] ss:$16 sm:$0x3] %vm142_vm1, %v1651_v51   ;;  %2218 = vst.msk [vmem:[%s4093_s1 + $0x20c] ss:$16 sm:$0xc] %vm142_vm1, %v1651_v51  }
 0x139   :  { %2219 = vst.msk [vmem:[%s4093_s1 + $0x20c] ss:$16 sm:$0x30] %vm142_vm1, %v1651_v51   ;;  %2220 = vst.msk [vmem:[%s4093_s1 + $0x20c] ss:$16 sm:$0xc0] %vm142_vm1, %v1651_v51   ;;  %v1769_v58 = vpop.permute.xlu0 %1768   ;;  %v1786_v59 = vpop.permute.xlu1 %1785  }
 0x13a   :  { %2221 = vst.msk [vmem:[%s4093_s1 + $0x28c] ss:$16 sm:$0x3] %vm142_vm1, %v1668_v52   ;;  %2222 = vst.msk [vmem:[%s4093_s1 + $0x28c] ss:$16 sm:$0xc] %vm142_vm1, %v1668_v52  }
 0x13b   :  { %2223 = vst.msk [vmem:[%s4093_s1 + $0x28c] ss:$16 sm:$0x30] %vm142_vm1, %v1668_v52   ;;  %2224 = vst.msk [vmem:[%s4093_s1 + $0x28c] ss:$16 sm:$0xc0] %vm142_vm1, %v1668_v52  }
 0x13c   :  { %2225 = vst.msk [vmem:[%s4093_s1 + $0x30c] ss:$16 sm:$0x3] %vm142_vm1, %v1685_v53   ;;  %2226 = vst.msk [vmem:[%s4093_s1 + $0x30c] ss:$16 sm:$0xc] %vm142_vm1, %v1685_v53  }
 0x13d   :  { %2227 = vst.msk [vmem:[%s4093_s1 + $0x30c] ss:$16 sm:$0x30] %vm142_vm1, %v1685_v53   ;;  %2228 = vst.msk [vmem:[%s4093_s1 + $0x30c] ss:$16 sm:$0xc0] %vm142_vm1, %v1685_v53   ;;  %v1803_v60 = vpop.permute.xlu0 %1802  }
 0x13e   :  { %2229 = vst.msk [vmem:[%s4093_s1 + $0xd] ss:$16 sm:$0x3] %vm142_vm1, %v1701_v54   ;;  %2230 = vst.msk [vmem:[%s4093_s1 + $0xd] ss:$16 sm:$0xc] %vm142_vm1, %v1701_v54  }
 0x13f   :  { %2231 = vst.msk [vmem:[%s4093_s1 + $0xd] ss:$16 sm:$0x30] %vm142_vm1, %v1701_v54   ;;  %2232 = vst.msk [vmem:[%s4093_s1 + $0xd] ss:$16 sm:$0xc0] %vm142_vm1, %v1701_v54  }
 0x140   :  { %2233 = vst.msk [vmem:[%s4093_s1 + $0x8d] ss:$16 sm:$0x3] %vm142_vm1, %v1718_v55   ;;  %2234 = vst.msk [vmem:[%s4093_s1 + $0x8d] ss:$16 sm:$0xc] %vm142_vm1, %v1718_v55  }
 0x141   :  { %2235 = vst.msk [vmem:[%s4093_s1 + $0x8d] ss:$16 sm:$0x30] %vm142_vm1, %v1718_v55   ;;  %2236 = vst.msk [vmem:[%s4093_s1 + $0x8d] ss:$16 sm:$0xc0] %vm142_vm1, %v1718_v55  }
 0x142   :  { %2237 = vst.msk [vmem:[%s4093_s1 + $0x10d] ss:$16 sm:$0x3] %vm142_vm1, %v1735_v56   ;;  %2238 = vst.msk [vmem:[%s4093_s1 + $0x10d] ss:$16 sm:$0xc] %vm142_vm1, %v1735_v56  }
 0x143   :  { %2239 = vst.msk [vmem:[%s4093_s1 + $0x10d] ss:$16 sm:$0x30] %vm142_vm1, %v1735_v56   ;;  %2240 = vst.msk [vmem:[%s4093_s1 + $0x10d] ss:$16 sm:$0xc0] %vm142_vm1, %v1735_v56  }
 0x144   :  { %2241 = vst.msk [vmem:[%s4093_s1 + $0x18d] ss:$16 sm:$0x3] %vm142_vm1, %v1752_v57   ;;  %2242 = vst.msk [vmem:[%s4093_s1 + $0x18d] ss:$16 sm:$0xc] %vm142_vm1, %v1752_v57  }
 0x145   :  { %2243 = vst.msk [vmem:[%s4093_s1 + $0x18d] ss:$16 sm:$0x30] %vm142_vm1, %v1752_v57   ;;  %2244 = vst.msk [vmem:[%s4093_s1 + $0x18d] ss:$16 sm:$0xc0] %vm142_vm1, %v1752_v57  }
 0x146   :  { %2245 = vst.msk [vmem:[%s4093_s1 + $0x20d] ss:$16 sm:$0x3] %vm142_vm1, %v1769_v58   ;;  %2246 = vst.msk [vmem:[%s4093_s1 + $0x20d] ss:$16 sm:$0xc] %vm142_vm1, %v1769_v58  }
 0x147   :  { %2247 = vst.msk [vmem:[%s4093_s1 + $0x20d] ss:$16 sm:$0x30] %vm142_vm1, %v1769_v58   ;;  %2248 = vst.msk [vmem:[%s4093_s1 + $0x20d] ss:$16 sm:$0xc0] %vm142_vm1, %v1769_v58  }
 0x148   :  { %2249 = vst.msk [vmem:[%s4093_s1 + $0x28d] ss:$16 sm:$0x3] %vm142_vm1, %v1786_v59   ;;  %2250 = vst.msk [vmem:[%s4093_s1 + $0x28d] ss:$16 sm:$0xc] %vm142_vm1, %v1786_v59  }
 0x149   :  { %2251 = vst.msk [vmem:[%s4093_s1 + $0x28d] ss:$16 sm:$0x30] %vm142_vm1, %v1786_v59   ;;  %2252 = vst.msk [vmem:[%s4093_s1 + $0x28d] ss:$16 sm:$0xc0] %vm142_vm1, %v1786_v59  }
 0x14a   :  { %2253 = vst.msk [vmem:[%s4093_s1 + $0x30d] ss:$16 sm:$0x3] %vm142_vm1, %v1803_v60   ;;  %2254 = vst.msk [vmem:[%s4093_s1 + $0x30d] ss:$16 sm:$0xc] %vm142_vm1, %v1803_v60  }
 0x14b   :  { %2255 = vst.msk [vmem:[%s4093_s1 + $0x30d] ss:$16 sm:$0x30] %vm142_vm1, %v1803_v60   ;;  %2256 = vst.msk [vmem:[%s4093_s1 + $0x30d] ss:$16 sm:$0xc0] %vm142_vm1, %v1803_v60  }

// kernel: net_forward.2
= control target key start
LH: loop header
LB: loop body
LE: loop exit
PB: predicated region body
PF: predicated region fallthrough
CT: control target
= control target key end

     0   :  { %s997_s18 = smov 0   ;;  %s1151_s0 = inlined_call_operand.vmem [shape: f32[8,392], index: 0, kind: input, shape index: {}]   ;;  %s1152_s1 = inlined_call_operand.vmem [shape: f32[16,8], index: 1, kind: input, shape index: {}]   ;;  %s1153_s2 = inlined_call_operand.vmem [shape: f32[32,8], index: 2, kind: input, shape index: {}]   ;;  %s1154_s3 = inlined_call_operand.vmem [shape: f32[32,16], index: 3, kind: input, shape index: {}]   ;;  %s1155_s4 = inlined_call_operand.vmem [shape: f32[4,16], index: 4, kind: input, shape index: {}]   ;;  %s1156_s5 = inlined_call_operand.vmem [shape: f32[4,392], index: 5, kind: output, shape index: {}]  }
   0x1 LB: > { %s891_s19 = sadd.s32 4294967295, %s958_s18   ;;  %p895_p0 = scmp.ge.s32.totalorder %s958_s18, 1  ;;  %s958_s18 = sphi %s997_s18, %s15_s18  }
   0x2   : > { %p188_p1 = scmp.lt.s32.totalorder %s958_s18, 3 }
   0x4   : > { %p189_p2 = pnand %p895_p0, %p188_p1 }
   0x5   : > { %s896_s20 = sshll.u32 (!%p189_p2), %s891_s19, 1 }
   0x6   : > { %192 = sbr.rel (%p189_p2) target bundleno = 939 (0x3ab), region = 40  ;;  %p217_p3 = scmp.lt.s32.totalorder (!%p189_p2), %s896_s20, 3 }
   0xb   : > { %v960_v0 = vmov 0.0   ;;  %s1160_s20 = smov (!%p217_p3, %s896_s20), 3  ;;  %v961_v27 = vmov 683565275   ;;  %v962_v29 = vmov 2475754826  }
   0xc   : > { %513 = vmatprep.mubr.f32.mxu0 %v960_v0  ;;  %608 = vmatprep.mubr.f32.mxu1 %v960_v0  ;;  %s897_s21 = sshll.u32 %s1160_s20, 3  ;;  %v963_v31 = vmov 2131351028   ;;  %v964_v33 = vmov 2102212464  }
   0xd   : > { %s220_s24 = scalar_lea.vmem %s1151_s0, %s897_s21  ;;  %v965_v35 = vmov 920167782   ;;  %v966_v43 = vmov 1326507024  }
   0xe   : > { %v229_v1 = vld [vmem:[%s220_s24 + $0x8] sm:$0xff]  ;;  %v228_v2 = vld [vmem:[%s220_s24] sm:$0xff]  ;;  %s899_s24 = sshll.u32 %s1160_s20, 2 }
   0xf   : > { %v1013_v3 = vmul.f32 1.5707964, %v229_v1  ;;  %v1015_v4 = vmul.f32 1.5707964, %v228_v2  ;;  %s226_s27 = scalar_lea.vmem %s1156_s5, %s899_s24 }
  0x11   : > { %v336_v5 = vand.u32 2147483647, %v1013_v3  ;;  %v339_v6 = vand.u32 2139095040, %v1013_v3  ;;  %v232_v7 = vand.u32 2147483647, %v1015_v4  ;;  %v235_v8 = vand.u32 2139095040, %v1015_v4 }
  0x12   : > { %vm338_vm14 = vcmp.lt.s32.totalorder %v1013_v3, 0 }
  0x13   : > { %v340_v9 = vshrl.u32 %v339_v6, 23  ;;  %v343_v10 = vand.u32 8388607, %v336_v5  ;;  %v236_v11 = vshrl.u32 %v235_v8, 23  ;;  %v239_v12 = vand.u32 8388607, %v232_v7 }
  0x14   : > { %vm1076_vm15 = vcmp.le.f32.partialorder %v336_v5, 0.7853982 }
  0x15   : > { %v904_v13 = vadd.s32 4294967169, %v340_v9  ;;  %v900_v14 = vadd.s32 4294967169, %v236_v11  ;;  %v344_v16 = vor.u32 8388608, %v343_v10  ;;  %v240_v17 = vor.u32 8388608, %v239_v12 }
  0x17   : > { %v346_v15 = vadd.s32 1, %v904_v13  ;;  %v242_v18 = vadd.s32 1, %v900_v14  ;;  %v1025_v23 = vshll.u32 %v344_v16, 8  ;;  %v1027_v25 = vshll.u32 %v240_v17, 8 }
  0x19   : > { %vm347_vm0 = vcmp.gt.s32.totalorder %v346_v15, 0  ;;  %vm243_vm1 = vcmp.gt.s32.totalorder %v242_v18, 0 }
  0x1a   : > { %v348_v19 = vsel %vm347_vm0, %v346_v15, 0  ;;  %v244_v22 = vsel %vm243_vm1, %v242_v18, 0  ;;  %vm234_vm0 = vcmp.lt.s32.totalorder %v1015_v4, 0  ;;  %vm233_vm1 = vcmp.le.f32.partialorder %v232_v7, 0.7853982 }
  0x1b   : > { %v349_v20 = vshrl.u32 %v348_v19, 5  ;;  %v350_v21 = vand.u32 31, %v348_v19  ;;  %v246_v24 = vand.u32 31, %v244_v22  ;;  %v1029_v37 = vshrl.u32 %v244_v22, 5 }
  0x1d   : > { %v351_v26 = vsub.s32 32, %v350_v21  ;;  %v353_v28 = vshll.u32 %v961_v27, %v350_v21  ;;  %v356_v30 = vshll.u32 %v962_v29, %v350_v21  ;;  %v359_v32 = vshll.u32 %v963_v31, %v350_v21 }
  0x1e   : > { %v362_v34 = vshll.u32 %v964_v33, %v350_v21  ;;  %v365_v36 = vshll.u32 %v965_v35, %v350_v21  ;;  %vm368_vm2 = vcmp.lt.s32.totalorder %v349_v20, 1  ;;  %vm369_vm3 = vcmp.lt.s32.totalorder %v349_v20, 2 }
  0x1f   : > { %v352_v38 = vshrl.u32 %v961_v27, %v351_v26  ;;  %v354_v39 = vshrl.u32 %v962_v29, %v351_v26  ;;  %v357_v40 = vshrl.u32 %v963_v31, %v351_v26  ;;  %v360_v41 = vshrl.u32 %v964_v33, %v351_v26 }
  0x20   : > { %v363_v42 = vshrl.u32 %v965_v35, %v351_v26  ;;  %v366_v44 = vshrl.u32 %v966_v43, %v351_v26  ;;  %vm371_vm4 = vcmp.lt.s32.totalorder %v349_v20, 4  ;;  %v247_v48 = vsub.s32 32, %v246_v24 }
  0x21   : > { %v355_v45 = vor.u32 %v354_v39, %v353_v28  ;;  %v358_v46 = vor.u32 %v357_v40, %v356_v30  ;;  %v361_v47 = vor.u32 %v360_v41, %v359_v32  ;;  %vm370_vm5 = vcmp.lt.s32.totalorder %v349_v20, 3 }
  0x22   : > { %v364_v49 = vor.u32 %v363_v42, %v362_v34  ;;  %v367_v50 = vor.u32 %v366_v44, %v365_v36  ;;  %v249_v51 = vshll.u32 %v961_v27, %v246_v24  ;;  %v252_v59 = vshll.u32 %v962_v29, %v246_v24 }
  0x23   : > { %v372_v52 = vsel %vm368_vm2, %v352_v38, %v355_v45  ;;  %v373_v53 = vsel %vm371_vm4, %v361_v47, 2102212464  ;;  %v376_v54 = vsel %vm368_vm2, %v355_v45, %v358_v46  ;;  %v380_v55 = vsel %vm368_vm2, %v358_v46, %v361_v47 }
  0x24   : > { %v374_v56 = vsel %vm370_vm5, %v358_v46, %v373_v53  ;;  %v377_v57 = vsel %vm371_vm4, %v364_v49, 920167782  ;;  %v381_v58 = vsel %vm371_vm4, %v367_v50, 1326507024  ;;  %v248_v62 = vshrl.u32 %v961_v27, %v247_v48 }
  0x25   : > { %v378_v60 = vsel %vm370_vm5, %v361_v47, %v377_v57  ;;  %v382_v61 = vsel %vm370_vm5, %v364_v49, %v381_v58  ;;  %v250_v63 = vshrl.u32 %v962_v29, %v247_v48  ;;  %v375_v1 = vsel %vm369_vm3, %v372_v52, %v374_v56 }
  0x26   : > { %v379_v2 = vsel %vm369_vm3, %v376_v54, %v378_v60  ;;  %v383_v6 = vsel %vm369_vm3, %v380_v55, %v382_v61  ;;  %v253_v8 = vshrl.u32 %v963_v31, %v247_v48  ;;  %v255_v15 = vshll.u32 %v963_v31, %v246_v24 }
  0x27   : > { %v1038_v9 = vmul.u32.u64.low %v1025_v23, %v383_v6  ;;  %v1039_v10 = vmul.u32.u64.high %v1025_v23, %v383_v6, %v1038_v9  ;;  %v1042_v11 = vmul.u32.u64.low %v1025_v23, %v379_v2  ;;  %v1043_v12 = vmul.u32.u64.high %v1025_v23, %v379_v2, %v1042_v11 }
  0x28   : > { %v251_v13 = vor.u32 %v250_v63, %v249_v51  ;;  %v254_v14 = vor.u32 %v253_v8, %v252_v59  ;;  %v256_v16 = vshrl.u32 %v964_v33, %v247_v48  ;;  %v258_v17 = vshll.u32 %v964_v33, %v246_v24 }
  0x29   : > { %v259_v18 = vshrl.u32 %v965_v35, %v247_v48  ;;  %v261_v19 = vshll.u32 %v965_v35, %v246_v24  ;;  %v262_v21 = vshrl.u32 %v966_v43, %v247_v48  ;;  %v391_v20 = vmul.u32 %v1025_v23, %v375_v1 }
  0x2a   : > { %v257_v22 = vor.u32 %v256_v16, %v255_v15  ;;  %vm264_vm6 = vcmp.lt.s32.totalorder %v1029_v37, 1  ;;  %vm265_vm7 = vcmp.lt.s32.totalorder %v1029_v37, 2  ;;  %vm393_vm8 = vc.u32 %v1039_v10, %v1042_v11 }
  0x2b   : > { %v394_v26 = vadd.s32 1, %v1043_v12  ;;  %v260_v27 = vor.u32 %v259_v18, %v258_v17  ;;  %vm266_vm9 = vcmp.lt.s32.totalorder %v1029_v37, 3  ;;  %v263_v28 = vor.u32 %v262_v21, %v261_v19 }
  0x2c   : > { %vm267_vm10 = vcmp.lt.s32.totalorder %v1029_v37, 4  ;;  %v268_v29 = vsel %vm264_vm6, %v248_v62, %v251_v13  ;;  %v272_v24 = vsel %vm264_vm6, %v251_v13, %v254_v14  ;;  %v276_v32 = vsel %vm264_vm6, %v254_v14, %v257_v22 }
  0x2d   : > { %v395_v30 = vsel %vm393_vm8, %v394_v26, %v1043_v12  ;;  %v269_v23 = vsel %vm267_vm10, %v257_v22, 2102212464  ;;  %v273_v31 = vsel %vm267_vm10, %v260_v27, 920167782  ;;  %v277_v36 = vsel %vm267_vm10, %v263_v28, 1326507024 }
  0x2e   : > { %v396_v33 = vadd.s32 %v395_v30, %v391_v20  ;;  %v270_v34 = vsel %vm266_vm9, %v254_v14, %v269_v23  ;;  %v274_v35 = vsel %vm266_vm9, %v257_v22, %v273_v31  ;;  %v278_v40 = vsel %vm266_vm9, %v260_v27, %v277_v36 }
  0x2f   : > { %v271_v38 = vsel %vm265_vm7, %v268_v29, %v270_v34  ;;  %v275_v39 = vsel %vm265_vm7, %v272_v24, %v274_v35  ;;  %v279_v42 = vsel %vm265_vm7, %v276_v32, %v278_v40  ;;  %v392_v61 = vadd.s32 %v1042_v11, %v1039_v10  ;;  %v638_v29 = vld [vmem:[%s1154_s3 + $0x8] sm:$0xff] }
  0x30   : > { %v397_v41 = vadd.s32 536870912, %v396_v33  ;;  %v1060_v43 = vmul.u32.u64.low %v1027_v25, %v275_v39  ;;  %v1061_v44 = vmul.u32.u64.high %v1027_v25, %v275_v39, %v1060_v43  ;;  %v287_v48 = vmul.u32 %v1027_v25, %v271_v38 }
  0x31   : > { %v1064_v45 = vmul.u32.u64.low %v1027_v25, %v279_v42  ;;  %v1065_v46 = vmul.u32.u64.high %v1027_v25, %v279_v42, %v1064_v45  ;;  %vm428_vm5 = vweird.f32 %v1013_v3  ;;  %vm324_vm9 = vweird.f32 %v1015_v4 }
  0x32   : > { %v398_v47 = vshrl.u32 %v397_v41, 30  ;;  %v290_v50 = vadd.s32 1, %v1061_v44  ;;  %vm442_vm10 = vcmask 64512  }
  0x33   : > { %vm289_vm11 = vc.u32 %v1065_v46, %v1060_v43  ;;  %v288_v18 = vadd.s32 %v1060_v43, %v1065_v46 }
  0x34   : > { %v399_v49 = vshll.u32 %v398_v47, 30  ;;  %v291_v37 = vsel %vm289_vm11, %v290_v50, %v1061_v44  ;;  %v422_v26 = vsub.s32 4, %v398_v47  ;;  %vm641_vm11 = vcmask 130048  }
  0x35   : > { %v292_v52 = vadd.s32 %v291_v37, %v287_v48 }
  0x36   : > { %v400_v51 = vsub.s32 %v396_v33, %v399_v49  ;;  %v423_v32 = vsel %vm338_vm14, %v422_v26, %v398_v47 }
  0x37   : > { %v293_v54 = vadd.s32 536870912, %v292_v52  ;;  %v425_v5 = vsel %vm1076_vm15, 0, %v423_v32 }
  0x38   : > { %v402_v53 = vsub.s32 0, %v400_v51  ;;  %v429_v40 = vadd.s32 3, %v425_v5 }
  0x39   : > { %v294_v56 = vshrl.u32 %v293_v54, 30 }
  0x3a   : > { %v905_v55 = vmin.u32 %v402_v53, %v400_v51  ;;  %v430_v45 = vand.u32 3, %v429_v40 }
  0x3b   : > { %v295_v58 = vshll.u32 %v294_v56, 30  ;;  %v318_v39 = vsub.s32 4, %v294_v56 }
  0x3c   : > { %v404_v57 = vclz %v905_v55  ;;  %vm435_vm2 = vcmp.eq.s32.totalorder %v430_v45, 2  ;;  %vm432_vm3 = vcmp.eq.s32.totalorder %v430_v45, 0  ;;  %vm431_vm4 = vcmp.lt.s32.totalorder %v430_v45, 2 }
  0x3d   : > { %v296_v60 = vsub.s32 %v292_v52, %v295_v58  ;;  %v319_v43 = vsel %vm234_vm0, %v318_v39, %v294_v56 }
  0x3e   : > { %v906_v59 = vadd.s32 4294967294, %v404_v57  ;;  %v321_v46 = vsel %vm233_vm1, 0, %v319_v43 }
  0x3f   : > { %v298_v62 = vsub.s32 0, %v296_v60  ;;  %v325_v50 = vadd.s32 3, %v321_v46 }
  0x40   : > { %vm907_vm12 = vcmp.lt.s32.totalorder %v906_v59, 0 }
  0x41   : > { %v407_v25 = vsel %vm907_vm12, 0, %v906_v59  ;;  %v901_v6 = vmin.u32 %v298_v62, %v296_v60  ;;  %v326_v53 = vand.u32 3, %v325_v50  ;;  %v441_v62 = vld [vmem:[%s1152_s1 + $0x8] sm:$0xff] }
  0x42   : > { %v408_v63 = vsub.s32 32, %v407_v25  ;;  %v409_v1 = vshll.u32 %v400_v51, %v407_v25  ;;  %v412_v2 = vsub.s32 4294967266, %v407_v25 }
  0x43   : > { %v300_v12 = vclz %v901_v6  ;;  %vm331_vm6 = vcmp.eq.s32.totalorder %v326_v53, 2  ;;  %vm328_vm7 = vcmp.eq.s32.totalorder %v326_v53, 0  ;;  %vm327_vm8 = vcmp.lt.s32.totalorder %v326_v53, 2 }
  0x44   : > { %v410_v8 = vshrl.u32 %v392_v61, %v408_v63  ;;  %v413_v9 = vadd.s32 127, %v412_v2 }
  0x45   : > { %v902_v15 = vadd.s32 4294967294, %v300_v12  ;;  %v529_v12 = vld [vmem:[%s1153_s2 + $0x8] sm:$0xff] }
  0x46   : > { %v411_v13 = vor.u32 %v410_v8, %v409_v1  ;;  %v414_v14 = vshll.u32 %v413_v9, 23  ;;  %v528_v9 = vld [vmem:[%s1153_s2] sm:$0xff] }
  0x47   : > { %vm903_vm13 = vcmp.lt.s32.totalorder %v902_v15, 0 }
  0x48   : > { %v415_v16 = vor.u32 4788187, %v414_v14  ;;  %v418_v17 = vcvt.s32.f32 %v411_v13  ;;  %v303_v10 = vsel %vm903_vm13, 0, %v902_v15  ;;  %v530_v13 = vld [vmem:[%s1153_s2 + $0x10] sm:$0xff]  ;;  %v531_v14 = vld [vmem:[%s1153_s2 + $0x18] sm:$0xff] }
  0x49   : > { %v304_v11 = vsub.s32 32, %v303_v10  ;;  %v305_v21 = vshll.u32 %v296_v60, %v303_v10  ;;  %v308_v20 = vsub.s32 4294967266, %v303_v10 }
  0x4a   : > { %v416_v19 = vand.u32 2147483647, %v415_v16 }
  0x4b   : > { %v306_v27 = vshrl.u32 %v288_v18, %v304_v11  ;;  %v309_v28 = vadd.s32 127, %v308_v20 }
  0x4c   : > { %v419_v22 = vmul.f32 %v418_v17, %v416_v19 }
  0x4d   : > { %v307_v30 = vor.u32 %v306_v27, %v305_v21  ;;  %v310_v23 = vshll.u32 %v309_v28, 23  ;;  %v637_v28 = vld [vmem:[%s1154_s3] sm:$0xff] }
  0x4e   : > { %v420_v24 = vxor.u32 2147483648, %v419_v22 }
  0x4f   : > { %v311_v34 = vor.u32 4788187, %v310_v23  ;;  %v314_v35 = vcvt.s32.f32 %v307_v30  ;;  %v640_v30 = vld [vmem:[%s1154_s3 + $0x18] sm:$0xff] }
  0x50   : > { %v421_v31 = vsel %vm338_vm14, %v420_v24, %v419_v22  ;;  %v639_v24 = vld [vmem:[%s1154_s3 + $0x10] sm:$0xff] }
  0x51   : > { %v424_v33 = vsel %vm1076_vm15, %v1013_v3, %v421_v31  ;;  %v312_v36 = vand.u32 2147483647, %v311_v34  ;;  %v440_v3 = vld [vmem:[%s1152_s1] sm:$0xff] }
  0x52   : > { %944 = vcosq.f32 %v424_v33 }
  0x53   : > { %946 = vsinq.f32 %v424_v33  ;;  %v315_v38 = vmul.f32 %v314_v35, %v312_v36 }
  0x55   : > { %v316_v41 = vxor.u32 2147483648, %v315_v38 }
  0x57   : > { %v317_v42 = vsel %vm234_vm0, %v316_v41, %v315_v38 }
  0x58   : > { %v320_v44 = vsel %vm233_vm1, %v1015_v4, %v317_v42 }
  0x59   : > { %948 = vcosq.f32 %v320_v44 }
  0x5a   : > { %950 = vsinq.f32 %v320_v44 }
  0x5f   : > { %v945_v47 = vpop.eup %944 }
  0x60   : > { %v947_v48 = vpop.eup %946  ;;  %v436_v49 = vxor.u32 2147483648, %v945_v47 }
  0x61   : > { %v433_v51 = vxor.u32 2147483648, %v947_v48 }
  0x62   : > { %v437_v7 = vsel %vm435_vm2, %v436_v49, %v947_v48  ;;  %v755_v49 = vld [vmem:[%s1155_s4] sm:$0xf] }
  0x63   : > { %v434_v37 = vsel %vm432_vm3, %v945_v47, %v433_v51 }
  0x64   : > { %v438_v52 = vsel %vm431_vm4, %v434_v37, %v437_v7 }
  0x65   : > { %v439_v54 = vsel %vm428_vm5, nan, %v438_v52 }
  0x66   : > { %479 = vmatprep.subr.mxu0 %v439_v54  ;;  %v949_v55 = vpop.eup %948 }
  0x67   : > { %v951_v56 = vpop.eup %950  ;;  %v332_v57 = vxor.u32 2147483648, %v949_v55 }
  0x68   : > { %v329_v58 = vxor.u32 2147483648, %v951_v56 }
  0x69   : > { %v333_v59 = vsel %vm331_vm6, %v332_v57, %v951_v56 }
  0x6a   : > { %v330_v60 = vsel %vm328_vm7, %v949_v55, %v329_v58 }
  0x6b   : > { %v334_v61 = vsel %vm327_vm8, %v330_v60, %v333_v59 }
  0x6c   : > { %v335_v25 = vsel %vm324_vm9, nan, %v334_v61 }
  0x6d   : > { %480 = vmatpush1.msra.mxu0 %v335_v25 }
  0x6e   : > { %908 = vmatmul.mubr.msk.f32.vlgmr.msra.gmra.mxu0 %vm442_vm10, %v440_v3 }
  0x6f   : > { %519 = vmatprep.mubr.f32.mxu0 %v960_v0 }
  0x72   : > { %909 = vmatmul.mubr.msk.f32.gmra.mxu0 %vm442_vm10, %v441_v62 }
  0x73   : > { %718 = vmatprep.mubr.f32.mxu0 %v960_v0 }
 0x12e   : > { %v515_v4 = vpop.f32.mrf.mxu0 }
 0x130   : > { %v517_v63 = vpop.f32.mrf.mxu0 }
 0x132   : > { %v521_v1 = vpop.f32.mrf.mxu0 }
 0x133   : > { %v526_v8 = vmul.f32 %v521_v1, %v515_v4 }
 0x134   : > { %v523_v2 = vpop.f32.mrf.mxu0 }
 0x135   : > { %v527_v6 = vmul.f32 %v523_v2, %v517_v63 }
 0x137   : > { %574 = vmatprep.subr.mxu1 %v527_v6 }
 0x138   : > { %575 = vmatpush1.msra.mxu1 %v526_v8 }
 0x139   : > { %910 = vmatmul.mubr.msk.f32.vlgmr.msra.gmra.mxu1 %vm442_vm10, %v528_v9 }
 0x13a   : > { %614 = vmatprep.mubr.f32.mxu1 %v960_v0 }
 0x13d   : > { %911 = vmatmul.mubr.msk.f32.gmra.mxu1 %vm442_vm10, %v529_v12 }
 0x13e   : > { %620 = vmatprep.mubr.f32.mxu1 %v960_v0 }
 0x141   : > { %912 = vmatmul.mubr.msk.f32.gmra.mxu1 %vm442_vm10, %v530_v13 }
 0x142   : > { %626 = vmatprep.mubr.f32.mxu1 %v960_v0 }
 0x145   : > { %913 = vmatmul.mubr.msk.f32.gmra.mxu1 %vm442_vm10, %v531_v14 }
 0x146   : > { %823 = vmatprep.mubr.f32.mxu1 %v960_v0 }
 0x1f9   : > { %v610_v15 = vpop.f32.mrf.mxu1 }
 0x1fb   : > { %v612_v16 = vpop.f32.mrf.mxu1 }
 0x1fd   : > { %v616_v17 = vpop.f32.mrf.mxu1 }
 0x1ff   : > { %v618_v18 = vpop.f32.mrf.mxu1 }
 0x201   : > { %v622_v19 = vpop.f32.mrf.mxu1 }
 0x202   : > { %v633_v27 = vmul.f32 %v622_v19, %v610_v15 }
 0x203   : > { %v624_v10 = vpop.f32.mrf.mxu1 }
 0x204   : > { %v634_v26 = vmul.f32 %v624_v10, %v612_v16 }
 0x205   : > { %v628_v11 = vpop.f32.mrf.mxu1 }
 0x206   : > { %v635_v22 = vmul.f32 %v628_v11, %v616_v17 }
 0x207   : > { %v630_v21 = vpop.f32.mrf.mxu1 }
 0x208   : > { %v636_v20 = vmul.f32 %v630_v21, %v618_v18 }
 0x20a   : > { %682 = vmatprep.subr.mxu0 %v636_v20 }
 0x20b   : > { %683 = vmatpush1.msra.mxu0 %v635_v22 }
 0x20c   : > { %684 = vmatprep.subr.mxu0 %v634_v26 }
 0x20d   : > { %685 = vmatpush1.msra.mxu0 %v633_v27 }
 0x20e   : > { %914 = vmatmul.mubr.msk.f32.vlgmr.msra.gmra.mxu0 %vm641_vm11, %v637_v28 }
 0x20f   : > { %724 = vmatprep.mubr.f32.mxu0 %v960_v0 }
 0x212   : > { %915 = vmatmul.mubr.msk.f32.gmra.mxu0 %vm641_vm11, %v638_v29 }
 0x213   : > { %730 = vmatprep.mubr.f32.mxu0 %v960_v0 }
 0x216   : > { %916 = vmatmul.mubr.msk.f32.gmra.mxu0 %vm641_vm11, %v639_v24 }
 0x217   : > { %736 = vmatprep.mubr.f32.mxu0 %v960_v0 }
 0x21a   : > { %917 = vmatmul.mubr.msk.f32.gmra.mxu0 %vm641_vm11, %v640_v30 }
 0x2ce   : > { %v720_v23 = vpop.f32.mrf.mxu0 }
 0x2cf   : > { %v743_v45 = vmul.f32 %v720_v23, %v720_v23 }
 0x2d0   : > { %v722_v31 = vpop.f32.mrf.mxu0 }
 0x2d1   : > { %v744_v43 = vmul.f32 %v722_v31, %v722_v31 }
 0x2d2   : > { %v726_v32 = vpop.f32.mrf.mxu0 }
 0x2d3   : > { %v745_v0 = vmul.f32 %v726_v32, %v726_v32 }
 0x2d4   : > { %v728_v33 = vpop.f32.mrf.mxu0 }
 0x2d5   : > { %v746_v39 = vmul.f32 %v728_v33, %v728_v33 }
 0x2d6   : > { %v732_v34 = vpop.f32.mrf.mxu0 }
 0x2d7   : > { %v747_v42 = vmul.f32 %v732_v34, %v732_v34 }
 0x2d8   : > { %v734_v35 = vpop.f32.mrf.mxu0 }
 0x2d9   : > { %v748_v40 = vmul.f32 %v734_v35, %v734_v35  ;;  %v751_v48 = vadd.f32 %v747_v42, %v743_v45 }
 0x2da   : > { %v738_v36 = vpop.f32.mrf.mxu0 }
 0x2db   : > { %v749_v5 = vmul.f32 %v738_v36, %v738_v36  ;;  %v752_v47 = vadd.f32 %v748_v40, %v744_v43 }
 0x2dc   : > { %v740_v38 = vpop.f32.mrf.mxu0 }
 0x2dd   : > { %v750_v41 = vmul.f32 %v740_v38, %v740_v38  ;;  %v753_v46 = vadd.f32 %v749_v5, %v745_v0 }
 0x2df   : > { %v754_v44 = vadd.f32 %v750_v41, %v746_v39 }
 0x2e1   : > { %787 = vmatprep.subr.mxu1 %v754_v44 }
 0x2e2   : > { %788 = vmatpush1.msra.mxu1 %v753_v46 }
 0x2e3   : > { %789 = vmatprep.subr.mxu1 %v752_v47 }
 0x2e4   : > { %790 = vmatpush1.msra.mxu1 %v751_v48 }
 0x2e5   : > { %918 = vmatmul.mubr.msk.f32.vlgmr.msra.gmra.mxu1 %vm641_vm11, %v755_v49 }
 0x3a5   : > { %v825_v50 = vpop.f32.mrf.mxu1 }
 0x3a7   : > { %v827_v51 = vpop.f32.mrf.mxu1 }
 0x3a8   : > { %v832_v7 = vcombine.low %v825_v50, %v827_v51 }
 0x3aa   : > { %834 = vst [vmem:[%s226_s27] sm:$0xff] %v832_v7 }
 0x3ab PF: > { %s15_s18 = sadd.s32 1, %s958_s18  }
 0x3ac   : > { %p12_p4 = scmp.ge.s32.totalorder %s15_s18, 4  }
 0x3ae   :  { %14 = sbr.rel (!%p12_p4) target bundleno = 1 (0x1), region = 70 }

// kernel: net_forward.3
= control target key start
LH: loop header
LB: loop body
LE: loop exit
PB: predicated region body
PF: predicated region fallthrough
CT: control target
= control target key end

     0   :  { %v1046_v3 = vmov 0   ;;  %vm222_vm0 = vcmask 130048   ;;  %vm689_vm1 = vcmask 523264   ;;  %vm771_vm2 = vcmask 15360   ;;  %s1648_s0 = inlined_call_operand.vmem [shape: f32[784,2], index: 0, kind: input, shape index: {}]   ;;  %s1649_s1 = inlined_call_operand.vmem [shape: f32[64,784], index: 1, kind: input, shape index: {}]   ;;  %s1650_s2 = inlined_call_operand.vmem [shape: f32[64,1], index: 2, kind: input, shape index: {}]   ;;  %s1651_s4 = inlined_call_operand.vmem [shape: f32[16,1], index: 4, kind: input, shape index: {}]   ;;  %s1652_s3 = inlined_call_operand.vmem [shape: f32[16,64], index: 3, kind: input, shape index: {}]   ;;  %s1653_s5 = inlined_call_operand.vmem [shape: f32[16,2], index: 5, kind: output, shape index: {}]  }
   0x1   :  { %v107_v0 = vld [vmem:[%s1648_s0 + $0xf8] sm:$0xff]  ;;  %1045 = vset.pattern.permute.xlu1 %v1046_v3  ;;  %1044 = vset.pattern.permute.xlu0 %v1046_v3  ;;  %v106_v5 = vld [vmem:[%s1648_s0 + $0xf0] sm:$0xff]  ;;  %v105_v9 = vld [vmem:[%s1648_s0 + $0xe8] sm:$0xff] }
   0x2   :  { %v139_v1 = vld [vmem:[%s1648_s0 + $0x1f8] sm:$0xff]  ;;  %788 = vmatprep.subr.mxu0 %v107_v0  ;;  %v138_v6 = vld [vmem:[%s1648_s0 + $0x1f0] sm:$0xff]  ;;  %v137_v10 = vld [vmem:[%s1648_s0 + $0x1e8] sm:$0xff] }
   0x3   :  { %v91_v2 = vld [vmem:[%s1648_s0 + $0x78] sm:$0xff]  ;;  %844 = vmatprep.subr.mxu1 %v139_v1  ;;  %v90_v7 = vld [vmem:[%s1648_s0 + $0x70] sm:$0xff]  ;;  %v89_v11 = vld [vmem:[%s1648_s0 + $0x68] sm:$0xff] }
   0x4   :  { %v123_v4 = vld [vmem:[%s1648_s0 + $0x178] sm:$0xff]  ;;  %789 = vmatpush3.msra.mxu0 %v91_v2  ;;  %v122_v8 = vld [vmem:[%s1648_s0 + $0x170] sm:$0xff]  ;;  %v121_v12 = vld [vmem:[%s1648_s0 + $0x168] sm:$0xff] }
   0x5   :  { %845 = vmatpush3.msra.mxu1 %v123_v4  ;;  %790 = vmatprep.subr.mxu0 %v106_v5  ;;  %v104_v13 = vld [vmem:[%s1648_s0 + $0xe0] sm:$0xff]  ;;  %v103_v17 = vld [vmem:[%s1648_s0 + $0xd8] sm:$0xff]  ;;  %v102_v21 = vld [vmem:[%s1648_s0 + $0xd0] sm:$0xff] }
   0x6   :  { %846 = vmatprep.subr.mxu1 %v138_v6  ;;  %791 = vmatpush3.msra.mxu0 %v90_v7  ;;  %v136_v14 = vld [vmem:[%s1648_s0 + $0x1e0] sm:$0xff]  ;;  %v135_v18 = vld [vmem:[%s1648_s0 + $0x1d8] sm:$0xff]  ;;  %v134_v22 = vld [vmem:[%s1648_s0 + $0x1d0] sm:$0xff] }
   0x7   :  { %847 = vmatpush3.msra.mxu1 %v122_v8  ;;  %792 = vmatprep.subr.mxu0 %v105_v9  ;;  %v88_v15 = vld [vmem:[%s1648_s0 + $0x60] sm:$0xff]  ;;  %v87_v19 = vld [vmem:[%s1648_s0 + $0x58] sm:$0xff]  ;;  %v86_v23 = vld [vmem:[%s1648_s0 + $0x50] sm:$0xff] }
   0x8   :  { %848 = vmatprep.subr.mxu1 %v137_v10  ;;  %v120_v16 = vld [vmem:[%s1648_s0 + $0x160] sm:$0xff]  ;;  %793 = vmatpush3.msra.mxu0 %v89_v11  ;;  %v119_v20 = vld [vmem:[%s1648_s0 + $0x158] sm:$0xff]  ;;  %v118_v24 = vld [vmem:[%s1648_s0 + $0x150] sm:$0xff] }
   0x9   :  { %849 = vmatpush3.msra.mxu1 %v121_v12  ;;  %794 = vmatprep.subr.mxu0 %v104_v13  ;;  %v101_v25 = vld [vmem:[%s1648_s0 + $0xc8] sm:$0xff]  ;;  %v100_v29 = vld [vmem:[%s1648_s0 + $0xc0] sm:$0xff]  ;;  %v99_v33 = vld [vmem:[%s1648_s0 + $0xb8] sm:$0xff] }
   0xa   :  { %850 = vmatprep.subr.mxu1 %v136_v14  ;;  %795 = vmatpush3.msra.mxu0 %v88_v15  ;;  %v133_v26 = vld [vmem:[%s1648_s0 + $0x1c8] sm:$0xff]  ;;  %v132_v30 = vld [vmem:[%s1648_s0 + $0x1c0] sm:$0xff]  ;;  %v131_v34 = vld [vmem:[%s1648_s0 + $0x1b8] sm:$0xff] }
   0xb   :  { %851 = vmatpush3.msra.mxu1 %v120_v16  ;;  %796 = vmatprep.subr.mxu0 %v103_v17  ;;  %v85_v27 = vld [vmem:[%s1648_s0 + $0x48] sm:$0xff]  ;;  %v84_v31 = vld [vmem:[%s1648_s0 + $0x40] sm:$0xff]  ;;  %v83_v35 = vld [vmem:[%s1648_s0 + $0x38] sm:$0xff] }
   0xc   :  { %852 = vmatprep.subr.mxu1 %v135_v18  ;;  %797 = vmatpush3.msra.mxu0 %v87_v19  ;;  %v117_v28 = vld [vmem:[%s1648_s0 + $0x148] sm:$0xff]  ;;  %v116_v32 = vld [vmem:[%s1648_s0 + $0x140] sm:$0xff]  ;;  %v115_v36 = vld [vmem:[%s1648_s0 + $0x138] sm:$0xff] }
   0xd   :  { %853 = vmatpush3.msra.mxu1 %v119_v20  ;;  %798 = vmatprep.subr.mxu0 %v102_v21  ;;  %v98_v37 = vld [vmem:[%s1648_s0 + $0xb0] sm:$0xff]  ;;  %v97_v41 = vld [vmem:[%s1648_s0 + $0xa8] sm:$0xff]  ;;  %v96_v45 = vld [vmem:[%s1648_s0 + $0xa0] sm:$0xff] }
   0xe   :  { %854 = vmatprep.subr.mxu1 %v134_v22  ;;  %799 = vmatpush3.msra.mxu0 %v86_v23  ;;  %v130_v38 = vld [vmem:[%s1648_s0 + $0x1b0] sm:$0xff]  ;;  %v129_v42 = vld [vmem:[%s1648_s0 + $0x1a8] sm:$0xff]  ;;  %v128_v46 = vld [vmem:[%s1648_s0 + $0x1a0] sm:$0xff] }
   0xf   :  { %855 = vmatpush3.msra.mxu1 %v118_v24  ;;  %800 = vmatprep.subr.mxu0 %v101_v25  ;;  %v82_v39 = vld [vmem:[%s1648_s0 + $0x30] sm:$0xff]  ;;  %v81_v43 = vld [vmem:[%s1648_s0 + $0x28] sm:$0xff]  ;;  %v80_v47 = vld [vmem:[%s1648_s0 + $0x20] sm:$0xff] }
  0x10   :  { %856 = vmatprep.subr.mxu1 %v133_v26  ;;  %801 = vmatpush3.msra.mxu0 %v85_v27  ;;  %v114_v40 = vld [vmem:[%s1648_s0 + $0x130] sm:$0xff]  ;;  %v113_v44 = vld [vmem:[%s1648_s0 + $0x128] sm:$0xff]  ;;  %v112_v48 = vld [vmem:[%s1648_s0 + $0x120] sm:$0xff] }
  0x11   :  { %857 = vmatpush3.msra.mxu1 %v117_v28  ;;  %802 = vmatprep.subr.mxu0 %v100_v29  ;;  %v95_v49 = vld [vmem:[%s1648_s0 + $0x98] sm:$0xff]  ;;  %v94_v53 = vld [vmem:[%s1648_s0 + $0x90] sm:$0xff]  ;;  %v93_v57 = vld [vmem:[%s1648_s0 + $0x88] sm:$0xff] }
  0x12   :  { %858 = vmatprep.subr.mxu1 %v132_v30  ;;  %803 = vmatpush3.msra.mxu0 %v84_v31  ;;  %v127_v50 = vld [vmem:[%s1648_s0 + $0x198] sm:$0xff]  ;;  %v126_v54 = vld [vmem:[%s1648_s0 + $0x190] sm:$0xff]  ;;  %v125_v58 = vld [vmem:[%s1648_s0 + $0x188] sm:$0xff] }
  0x13   :  { %859 = vmatpush3.msra.mxu1 %v116_v32  ;;  %804 = vmatprep.subr.mxu0 %v99_v33  ;;  %v79_v51 = vld [vmem:[%s1648_s0 + $0x18] sm:$0xff]  ;;  %v78_v55 = vld [vmem:[%s1648_s0 + $0x10] sm:$0xff]  ;;  %v77_v59 = vld [vmem:[%s1648_s0 + $0x8] sm:$0xff] }
  0x14   :  { %860 = vmatprep.subr.mxu1 %v131_v34  ;;  %805 = vmatpush3.msra.mxu0 %v83_v35  ;;  %v111_v52 = vld [vmem:[%s1648_s0 + $0x118] sm:$0xff]  ;;  %v110_v56 = vld [vmem:[%s1648_s0 + $0x110] sm:$0xff]  ;;  %v109_v60 = vld [vmem:[%s1648_s0 + $0x108] sm:$0xff] }
  0x15   :  { %861 = vmatpush3.msra.mxu1 %v115_v36  ;;  %806 = vmatprep.subr.mxu0 %v98_v37  ;;  %v92_v61 = vld [vmem:[%s1648_s0 + $0x80] sm:$0xff]  ;;  %v21_v0 = vld [vmem:[%s1649_s1 + $0x8] sm:$0xff]  ;;  %v23_v2 = vld [vmem:[%s1649_s1 + $0x18] sm:$0xff] }
  0x16   :  { %862 = vmatprep.subr.mxu1 %v130_v38  ;;  %807 = vmatpush3.msra.mxu0 %v82_v39  ;;  %v124_v62 = vld [vmem:[%s1648_s0 + $0x180] sm:$0xff]  ;;  %v22_v4 = vld [vmem:[%s1649_s1 + $0x10] sm:$0xff]  ;;  %v171_v5 = vld [vmem:[%s1648_s0 + $0x2f8] sm:$0xff] }
  0x17   :  { %863 = vmatpush3.msra.mxu1 %v114_v40  ;;  %808 = vmatprep.subr.mxu0 %v97_v41  ;;  %v76_v63 = vld [vmem:[%s1648_s0] sm:$0xff]  ;;  %v155_v6 = vld [vmem:[%s1648_s0 + $0x278] sm:$0xff]  ;;  %v170_v7 = vld [vmem:[%s1648_s0 + $0x2f0] sm:$0xff] }
  0x18   :  { %864 = vmatprep.subr.mxu1 %v129_v42  ;;  %809 = vmatpush3.msra.mxu0 %v81_v43  ;;  %v108_v1 = vld [vmem:[%s1648_s0 + $0x100] sm:$0xff]  ;;  %v30_v9 = vld [vmem:[%s1649_s1 + $0x50] sm:$0xff]  ;;  %v27_v11 = vld [vmem:[%s1649_s1 + $0x38] sm:$0xff] }
  0x19   :  { %865 = vmatpush3.msra.mxu1 %v113_v44  ;;  %810 = vmatprep.subr.mxu0 %v96_v45  ;;  %v20_v3 = vld [vmem:[%s1649_s1] sm:$0xff]  ;;  %v154_v10 = vld [vmem:[%s1648_s0 + $0x270] sm:$0xff]  ;;  %v29_v12 = vld [vmem:[%s1649_s1 + $0x48] sm:$0xff] }
  0x1a   :  { %866 = vmatprep.subr.mxu1 %v128_v46  ;;  %811 = vmatpush3.msra.mxu0 %v80_v47  ;;  %v28_v8 = vld [vmem:[%s1649_s1 + $0x40] sm:$0xff]  ;;  %v169_v13 = vld [vmem:[%s1648_s0 + $0x2e8] sm:$0xff]  ;;  %v35_v16 = vld [vmem:[%s1649_s1 + $0x78] sm:$0xff] }
  0x1b   :  { %867 = vmatpush3.msra.mxu1 %v112_v48  ;;  %812 = vmatprep.subr.mxu0 %v95_v49  ;;  %v153_v14 = vld [vmem:[%s1648_s0 + $0x268] sm:$0xff]  ;;  %v168_v15 = vld [vmem:[%s1648_s0 + $0x2e0] sm:$0xff]  ;;  %v34_v19 = vld [vmem:[%s1649_s1 + $0x70] sm:$0xff] }
  0x1c   :  { %868 = vmatprep.subr.mxu1 %v127_v50  ;;  %813 = vmatpush3.msra.mxu0 %v79_v51  ;;  %v37_v17 = vld [vmem:[%s1649_s1 + $0x88] sm:$0xff]  ;;  %v152_v18 = vld [vmem:[%s1648_s0 + $0x260] sm:$0xff]  ;;  %v167_v21 = vld [vmem:[%s1648_s0 + $0x2d8] sm:$0xff] }
  0x1d   :  { %869 = vmatpush3.msra.mxu1 %v111_v52  ;;  %814 = vmatprep.subr.mxu0 %v94_v53  ;;  %v36_v20 = vld [vmem:[%s1649_s1 + $0x80] sm:$0xff]  ;;  %v151_v22 = vld [vmem:[%s1648_s0 + $0x258] sm:$0xff]  ;;  %v166_v23 = vld [vmem:[%s1648_s0 + $0x2d0] sm:$0xff] }
  0x1e   :  { %870 = vmatprep.subr.mxu1 %v126_v54  ;;  %815 = vmatpush3.msra.mxu0 %v78_v55  ;;  %v42_v24 = vld [vmem:[%s1649_s1 + $0xb0] sm:$0xff]  ;;  %v44_v25 = vld [vmem:[%s1649_s1 + $0xc0] sm:$0xff]  ;;  %v41_v27 = vld [vmem:[%s1649_s1 + $0xa8] sm:$0xff] }
  0x1f   :  { %871 = vmatpush3.msra.mxu1 %v110_v56  ;;  %816 = vmatprep.subr.mxu0 %v93_v57  ;;  %v150_v26 = vld [vmem:[%s1648_s0 + $0x250] sm:$0xff]  ;;  %v43_v28 = vld [vmem:[%s1649_s1 + $0xb8] sm:$0xff]  ;;  %v165_v29 = vld [vmem:[%s1648_s0 + $0x2c8] sm:$0xff] }
  0x20   :  { %872 = vmatprep.subr.mxu1 %v125_v58  ;;  %817 = vmatpush3.msra.mxu0 %v77_v59  ;;  %v149_v30 = vld [vmem:[%s1648_s0 + $0x248] sm:$0xff]  ;;  %v164_v31 = vld [vmem:[%s1648_s0 + $0x2c0] sm:$0xff]  ;;  %v51_v33 = vld [vmem:[%s1649_s1 + $0xf8] sm:$0xff] }
  0x21   :  { %873 = vmatpush3.msra.mxu1 %v109_v60  ;;  %818 = vmatprep.subr.mxu0 %v92_v61  ;;  %v49_v32 = vld [vmem:[%s1649_s1 + $0xe8] sm:$0xff]  ;;  %v148_v34 = vld [vmem:[%s1648_s0 + $0x240] sm:$0xff]  ;;  %v50_v36 = vld [vmem:[%s1649_s1 + $0xf0] sm:$0xff] }
  0x22   :  { %874 = vmatprep.subr.mxu1 %v124_v62  ;;  %819 = vmatpush3.msra.mxu0 %v76_v63  ;;  %v48_v35 = vld [vmem:[%s1649_s1 + $0xe0] sm:$0xff]  ;;  %v163_v37 = vld [vmem:[%s1648_s0 + $0x2b8] sm:$0xff]  ;;  %v162_v39 = vld [vmem:[%s1648_s0 + $0x2b0] sm:$0xff] }
  0x23   :  { %311 = vmatprep.mubr.f32.mxu0 %v21_v0  ;;  %875 = vmatpush3.msra.mxu1 %v108_v1  ;;  %v147_v38 = vld [vmem:[%s1648_s0 + $0x238] sm:$0xff]  ;;  %v56_v40 = vld [vmem:[%s1649_s1 + $0x120] sm:$0xff]  ;;  %v58_v41 = vld [vmem:[%s1649_s1 + $0x130] sm:$0xff] }
  0x24   :  { %416 = vmatprep.mubr.f32.mxu1 %v23_v2  ;;  %312 = vmatmul.mubr.f32.vlgmr.msra.gmra.mxu0 %v20_v3  ;;  %v146_v42 = vld [vmem:[%s1648_s0 + $0x230] sm:$0xff]  ;;  %v55_v43 = vld [vmem:[%s1649_s1 + $0x118] sm:$0xff]  ;;  %v57_v44 = vld [vmem:[%s1649_s1 + $0x128] sm:$0xff] }
  0x25   :  { %417 = vmatmul.mubr.f32.vlgmr.msra.gmra.mxu1 %v22_v4  ;;  %900 = vmatprep.subr.mxu0 %v171_v5  ;;  %v161_v45 = vld [vmem:[%s1648_s0 + $0x2a8] sm:$0xff]  ;;  %v160_v47 = vld [vmem:[%s1648_s0 + $0x2a0] sm:$0xff]  ;;  %v63_v48 = vld [vmem:[%s1649_s1 + $0x158] sm:$0xff] }
  0x26   :  { %1011 = vmatprep.subr.mxu1 %v171_v5  ;;  %901 = vmatpush3.msra.mxu0 %v155_v6  ;;  %v145_v46 = vld [vmem:[%s1648_s0 + $0x228] sm:$0xff]  ;;  %v144_v50 = vld [vmem:[%s1648_s0 + $0x220] sm:$0xff]  ;;  %v62_v51 = vld [vmem:[%s1649_s1 + $0x150] sm:$0xff] }
  0x27   :  { %1027 = vmatpush3.msra.mxu1 %v155_v6  ;;  %902 = vmatprep.subr.mxu0 %v170_v7  ;;  %v65_v49 = vld [vmem:[%s1649_s1 + $0x168] sm:$0xff]  ;;  %v64_v52 = vld [vmem:[%s1649_s1 + $0x160] sm:$0xff]  ;;  %v159_v53 = vld [vmem:[%s1648_s0 + $0x298] sm:$0xff] }
  0x28   :  { %1012 = vmatprep.subr.mxu1 %v170_v7  ;;  %316 = vmatprep.mubr.f32.mxu0 %v28_v8  ;;  %v143_v54 = vld [vmem:[%s1648_s0 + $0x218] sm:$0xff]  ;;  %v158_v55 = vld [vmem:[%s1648_s0 + $0x290] sm:$0xff]  ;;  %v72_v57 = vld [vmem:[%s1649_s1 + $0x1a0] sm:$0xff] }
  0x29   :  { %421 = vmatprep.mubr.f32.mxu1 %v30_v9  ;;  %903 = vmatpush3.msra.mxu0 %v154_v10  ;;  %v70_v56 = vld [vmem:[%s1649_s1 + $0x190] sm:$0xff]  ;;  %v69_v59 = vld [vmem:[%s1649_s1 + $0x188] sm:$0xff]  ;;  %v71_v60 = vld [vmem:[%s1649_s1 + $0x198] sm:$0xff] }
  0x2a   :  { %1028 = vmatpush3.msra.mxu1 %v154_v10  ;;  %317 = vmatmul.mubr.f32.gmra.mxu0 %v27_v11  ;;  %v142_v58 = vld [vmem:[%s1648_s0 + $0x210] sm:$0xff]  ;;  %v157_v61 = vld [vmem:[%s1648_s0 + $0x288] sm:$0xff]  ;;  %v156_v63 = vld [vmem:[%s1648_s0 + $0x280] sm:$0xff] }
  0x2b   :  { %422 = vmatmul.mubr.f32.gmra.mxu1 %v29_v12  ;;  %904 = vmatprep.subr.mxu0 %v169_v13  ;;  %v141_v62 = vld [vmem:[%s1648_s0 + $0x208] sm:$0xff]  ;;  %v140_v0 = vld [vmem:[%s1648_s0 + $0x200] sm:$0xff]  ;;  %v74_v2 = vld [vmem:[%s1649_s1 + $0x1b0] sm:$0xff] }
  0x2c   :  { %1013 = vmatprep.subr.mxu1 %v169_v13  ;;  %905 = vmatpush3.msra.mxu0 %v153_v14  ;;  %v25_v1 = vld [vmem:[%s1649_s1 + $0x28] sm:$0xff]  ;;  %v24_v3 = vld [vmem:[%s1649_s1 + $0x20] sm:$0xff]  ;;  %v26_v7 = vld [vmem:[%s1649_s1 + $0x30] sm:$0xff] }
  0x2d   :  { %1029 = vmatpush3.msra.mxu1 %v153_v14  ;;  %906 = vmatprep.subr.mxu0 %v168_v15  ;;  %v73_v4 = vld [vmem:[%s1649_s1 + $0x1a8] sm:$0xff]  ;;  %v32_v6 = vld [vmem:[%s1649_s1 + $0x60] sm:$0xff]  ;;  %v31_v10 = vld [vmem:[%s1649_s1 + $0x58] sm:$0xff] }
  0x2e   :  { %1014 = vmatprep.subr.mxu1 %v168_v15  ;;  %321 = vmatprep.mubr.f32.mxu0 %v35_v16  ;;  %v173_v5 = vld [vmem:[%s1648_s0 + $0x308] sm:$0xff]  ;;  %v172_v8 = vld [vmem:[%s1648_s0 + $0x300] sm:$0xff]  ;;  %v39_v12 = vld [vmem:[%s1649_s1 + $0x98] sm:$0xff] }
  0x2f   :  { %426 = vmatprep.mubr.f32.mxu1 %v37_v17  ;;  %907 = vmatpush3.msra.mxu0 %v152_v18  ;;  %v179_v9 = vld [vmem:[%s1650_s2 + $0x28] sm:$0xff]  ;;  %v40_v13 = vld [vmem:[%s1649_s1 + $0xa0] sm:$0xff]  ;;  %v181_v14 = vld [vmem:[%s1650_s2 + $0x38] sm:$0xff] }
  0x30   :  { %1030 = vmatpush3.msra.mxu1 %v152_v18  ;;  %322 = vmatmul.mubr.f32.gmra.mxu0 %v34_v19  ;;  %v33_v11 = vld [vmem:[%s1649_s1 + $0x68] sm:$0xff]  ;;  %v178_v15 = vld [vmem:[%s1650_s2 + $0x20] sm:$0xff]  ;;  %v38_v16 = vld [vmem:[%s1649_s1 + $0x90] sm:$0xff] }
  0x31   :  { %427 = vmatmul.mubr.f32.gmra.mxu1 %v36_v20  ;;  %908 = vmatprep.subr.mxu0 %v167_v21  ;;  %v47_v17 = vld [vmem:[%s1649_s1 + $0xd8] sm:$0xff]  ;;  %v46_v18 = vld [vmem:[%s1649_s1 + $0xd0] sm:$0xff] }
  0x32   :  { %1015 = vmatprep.subr.mxu1 %v167_v21  ;;  %909 = vmatpush3.msra.mxu0 %v151_v22  ;;  %v54_v19 = vld [vmem:[%s1649_s1 + $0x110] sm:$0xff] }
  0x33   :  { %1031 = vmatpush3.msra.mxu1 %v151_v22  ;;  %910 = vmatprep.subr.mxu0 %v166_v23  ;;  %v180_v20 = vld [vmem:[%s1650_s2 + $0x30] sm:$0xff]  ;;  %v45_v22 = vld [vmem:[%s1649_s1 + $0xc8] sm:$0xff] }
  0x34   :  { %1016 = vmatprep.subr.mxu1 %v166_v23  ;;  %326 = vmatprep.mubr.f32.mxu0 %v42_v24  ;;  %v176_v21 = vld [vmem:[%s1650_s2 + $0x10] sm:$0xff]  ;;  %v61_v23 = vld [vmem:[%s1649_s1 + $0x148] sm:$0xff] }
  0x35   :  { %431 = vmatprep.mubr.f32.mxu1 %v44_v25  ;;  %911 = vmatpush3.msra.mxu0 %v150_v26  ;;  %v53_v24 = vld [vmem:[%s1649_s1 + $0x108] sm:$0xff]  ;;  %v68_v25 = vld [vmem:[%s1649_s1 + $0x180] sm:$0xff] }
  0x36   :  { %1032 = vmatpush3.msra.mxu1 %v150_v26  ;;  %327 = vmatmul.mubr.f32.gmra.mxu0 %v41_v27  ;;  %v177_v26 = vld [vmem:[%s1650_s2 + $0x18] sm:$0xff]  ;;  %v174_v27 = vld [vmem:[%s1650_s2] sm:$0xff] }
  0x37   :  { %432 = vmatmul.mubr.f32.gmra.mxu1 %v43_v28  ;;  %912 = vmatprep.subr.mxu0 %v165_v29  ;;  %v52_v28 = vld [vmem:[%s1649_s1 + $0x100] sm:$0xff] }
  0x38   :  { %1017 = vmatprep.subr.mxu1 %v165_v29  ;;  %913 = vmatpush3.msra.mxu0 %v149_v30  ;;  %v75_v29 = vld [vmem:[%s1649_s1 + $0x1b8] sm:$0xff] }
  0x39   :  { %1033 = vmatpush3.msra.mxu1 %v149_v30  ;;  %914 = vmatprep.subr.mxu0 %v164_v31  ;;  %v60_v30 = vld [vmem:[%s1649_s1 + $0x140] sm:$0xff] }
  0x3a   :  { %1018 = vmatprep.subr.mxu1 %v164_v31  ;;  %331 = vmatprep.mubr.f32.mxu0 %v49_v32  ;;  %v175_v31 = vld [vmem:[%s1650_s2 + $0x8] sm:$0xff] }
  0x3b   :  { %436 = vmatprep.mubr.f32.mxu1 %v51_v33  ;;  %915 = vmatpush3.msra.mxu0 %v148_v34  ;;  %v678_v32 = vld [vmem:[%s1651_s4 + $0x8] sm:$0xff]  ;;  %v59_v33 = vld [vmem:[%s1649_s1 + $0x138] sm:$0xff] }
  0x3c   :  { %1034 = vmatpush3.msra.mxu1 %v148_v34  ;;  %332 = vmatmul.mubr.f32.gmra.mxu0 %v48_v35  ;;  %v67_v34 = vld [vmem:[%s1649_s1 + $0x178] sm:$0xff]  ;;  %v677_v35 = vld [vmem:[%s1651_s4] sm:$0xff] }
  0x3d   :  { %437 = vmatmul.mubr.f32.gmra.mxu1 %v50_v36  ;;  %916 = vmatprep.subr.mxu0 %v163_v37  ;;  %v66_v36 = vld [vmem:[%s1649_s1 + $0x170] sm:$0xff] }
  0x3e   :  { %1019 = vmatprep.subr.mxu1 %v163_v37  ;;  %917 = vmatpush3.msra.mxu0 %v147_v38  ;;  %v675_v37 = vld [vmem:[%s1652_s3] sm:$0xff] }
  0x3f   :  { %1035 = vmatpush3.msra.mxu1 %v147_v38  ;;  %918 = vmatprep.subr.mxu0 %v162_v39 }
  0x40   :  { %1020 = vmatprep.subr.mxu1 %v162_v39  ;;  %336 = vmatprep.mubr.f32.mxu0 %v56_v40 }
  0x41   :  { %441 = vmatprep.mubr.f32.mxu1 %v58_v41  ;;  %919 = vmatpush3.msra.mxu0 %v146_v42 }
  0x42   :  { %1036 = vmatpush3.msra.mxu1 %v146_v42  ;;  %337 = vmatmul.mubr.f32.gmra.mxu0 %v55_v43 }
  0x43   :  { %442 = vmatmul.mubr.f32.gmra.mxu1 %v57_v44  ;;  %920 = vmatprep.subr.mxu0 %v161_v45 }
  0x44   :  { %1021 = vmatprep.subr.mxu1 %v161_v45  ;;  %921 = vmatpush3.msra.mxu0 %v145_v46 }
  0x45   :  { %1037 = vmatpush3.msra.mxu1 %v145_v46  ;;  %922 = vmatprep.subr.mxu0 %v160_v47 }
  0x46   :  { %1022 = vmatprep.subr.mxu1 %v160_v47  ;;  %341 = vmatprep.mubr.f32.mxu0 %v63_v48 }
  0x47   :  { %446 = vmatprep.mubr.f32.mxu1 %v65_v49  ;;  %923 = vmatpush3.msra.mxu0 %v144_v50 }
  0x48   :  { %1038 = vmatpush3.msra.mxu1 %v144_v50  ;;  %342 = vmatmul.mubr.f32.gmra.mxu0 %v62_v51 }
  0x49   :  { %447 = vmatmul.mubr.f32.gmra.mxu1 %v64_v52  ;;  %924 = vmatprep.subr.mxu0 %v159_v53 }
  0x4a   :  { %1023 = vmatprep.subr.mxu1 %v159_v53  ;;  %925 = vmatpush3.msra.mxu0 %v143_v54 }
  0x4b   :  { %1039 = vmatpush3.msra.mxu1 %v143_v54  ;;  %926 = vmatprep.subr.mxu0 %v158_v55 }
  0x4c   :  { %1024 = vmatprep.subr.mxu1 %v158_v55  ;;  %346 = vmatprep.mubr.f32.mxu0 %v70_v56 }
  0x4d   :  { %451 = vmatprep.mubr.f32.mxu1 %v72_v57  ;;  %927 = vmatpush3.msra.mxu0 %v142_v58 }
  0x4e   :  { %1040 = vmatpush3.msra.mxu1 %v142_v58  ;;  %347 = vmatmul.mubr.f32.gmra.mxu0 %v69_v59 }
  0x4f   :  { %452 = vmatmul.mubr.f32.gmra.mxu1 %v71_v60  ;;  %928 = vmatprep.subr.mxu0 %v157_v61 }
  0x50   :  { %1025 = vmatprep.subr.mxu1 %v157_v61  ;;  %929 = vmatpush3.msra.mxu0 %v141_v62 }
  0x51   :  { %1041 = vmatpush3.msra.mxu1 %v141_v62  ;;  %930 = vmatprep.subr.mxu0 %v156_v63 }
  0x52   :  { %1026 = vmatprep.subr.mxu1 %v156_v63  ;;  %931 = vmatpush3.msra.mxu0 %v140_v0 }
  0x53   :  { %1042 = vmatpush3.msra.mxu1 %v140_v0  ;;  %521 = vmatprep.mubr.f32.mxu0 %v25_v1 }
  0x54   :  { %556 = vmatprep.mubr.f32.mxu1 %v74_v2  ;;  %522 = vmatmul.mubr.f32.vlgmr.msra.gmra.mxu0 %v24_v3 }
  0x55   :  { %557 = vmatmul.mubr.f32.vlgmr.msra.gmra.mxu1 %v73_v4  ;;  %976 = vmatprep.subr.mxu1 %v173_v5 }
  0x56   :  { %526 = vmatprep.mubr.f32.mxu0 %v32_v6  ;;  %977 = vmatpush3.msra.mxu1 %v173_v5 }
  0x57   :  { %980 = vmatprep.mubr.msk.f32.mxu1 %vm222_vm0, %v26_v7  ;;  %978 = vmatprep.subr.mxu1 %v172_v8 }
  0x58   :  { %209 = vperm.xlu1 %1045, %v179_v9   ;;  %979 = vmatpush3.msra.mxu1 %v172_v8 }
  0x59   :  { %527 = vmatmul.mubr.f32.gmra.mxu0 %v31_v10  ;;  %981 = vmatmul.mubr.msk.f32.vlgmr.msra.gmra.mxu1 %vm222_vm0, %v33_v11 }
  0x5a   :  { %531 = vmatprep.mubr.f32.mxu0 %v39_v12  ;;  %983 = vmatprep.mubr.msk.f32.mxu1 %vm222_vm0, %v40_v13 }
  0x5b   :  { %219 = vperm.xlu0 %1044, %v181_v14  }
  0x5c   :  { %204 = vperm.xlu1 %1045, %v178_v15  }
  0x5d   :  { %532 = vmatmul.mubr.f32.gmra.mxu0 %v38_v16  ;;  %984 = vmatmul.mubr.msk.f32.gmra.mxu1 %vm222_vm0, %v47_v17 }
  0x5e   :  { %536 = vmatprep.mubr.f32.mxu0 %v46_v18  ;;  %986 = vmatprep.mubr.msk.f32.mxu1 %vm222_vm0, %v54_v19 }
  0x5f   :  { %214 = vperm.xlu0 %1044, %v180_v20  }
  0x60   :  { %194 = vperm.xlu1 %1045, %v176_v21  }
  0x61   :  { %537 = vmatmul.mubr.f32.gmra.mxu0 %v45_v22  ;;  %987 = vmatmul.mubr.msk.f32.gmra.mxu1 %vm222_vm0, %v61_v23 }
  0x62   :  { %541 = vmatprep.mubr.f32.mxu0 %v53_v24  ;;  %989 = vmatprep.mubr.msk.f32.mxu1 %vm222_vm0, %v68_v25 }
  0x63   :  { %199 = vperm.xlu0 %1044, %v177_v26  }
  0x64   :  { %184 = vperm.xlu1 %1045, %v174_v27  }
  0x65   :  { %542 = vmatmul.mubr.f32.gmra.mxu0 %v52_v28  ;;  %990 = vmatmul.mubr.msk.f32.gmra.mxu1 %vm222_vm0, %v75_v29 }
  0x66   :  { %546 = vmatprep.mubr.f32.mxu0 %v60_v30  ;;  %1008 = vmatprep.mubr.msk.f32.mxu1 %vm689_vm1, %v675_v37 }
  0x67   :  { %189 = vperm.xlu0 %1044, %v175_v31  }
  0x68   :  { %686 = vperm.xlu1 %1045, %v678_v32  }
  0x69   :  { %547 = vmatmul.mubr.f32.gmra.mxu0 %v59_v33 }
  0x6a   :  { %551 = vmatprep.mubr.f32.mxu0 %v67_v34 }
  0x6b   :  { %681 = vperm.xlu0 %1044, %v677_v35  }
  0x6d   :  { %552 = vmatmul.mubr.f32.gmra.mxu0 %v66_v36 }
  0xd3   :  { %v1581_v38 = vpop.permute.xlu1 %209 }
  0xd6   :  { %v220_v22 = vpop.permute.xlu0 %219 }
  0xd7   :  { %v1583_v39 = vpop.permute.xlu1 %204 }
  0xda   :  { %v215_v33 = vpop.permute.xlu0 %214 }
  0xdb   :  { %v1585_v40 = vpop.permute.xlu1 %194 }
  0xdf   :  { %v185_v43 = vpop.permute.xlu1 %184 }
  0xe4   :  { %v820_v41 = vpop.f32.mrf.mxu0 }
  0xe5   :  { %v876_v42 = vpop.f32.mrf.mxu1 }
  0xe6   :  { %v821_v44 = vpop.f32.mrf.mxu0 }
  0xe7   :  { %v877_v45 = vpop.f32.mrf.mxu1  ;;  %v822_v46 = vadd.f32 %v821_v44, %v820_v41 }
  0xe8   :  { %v878_v47 = vadd.f32 %v877_v45, %v876_v42 }
  0xe9   :  { %v314_v48 = vadd.f32 %v822_v46, %v185_v43 }
  0xea   :  { %v1587_v49 = vpop.f32.mrf.mxu0 }
  0xeb   :  { %v1589_v50 = vpop.f32.mrf.mxu1  ;;  %v1591_v51 = vadd.f32 %v878_v47, %v314_v48  ;;  %v200_v47 = vpop.permute.xlu0 %199 }
  0xec   :  { %v1593_v52 = vpop.f32.mrf.mxu0 }
  0xed   :  { %v1595_v53 = vpop.f32.mrf.mxu1 }
  0xf0   :  { %v826_v54 = vpop.f32.mrf.mxu0 }
  0xf1   :  { %v1597_v55 = vpop.f32.mrf.mxu1 }
  0xf2   :  { %v827_v56 = vpop.f32.mrf.mxu0 }
  0xf3   :  { %v1599_v57 = vpop.f32.mrf.mxu1 }
  0xf6   :  { %v829_v58 = vpop.f32.mrf.mxu0 }
  0xf7   :  { %v1601_v59 = vpop.f32.mrf.mxu1 }
  0xf8   :  { %v830_v60 = vpop.f32.mrf.mxu0 }
  0xf9   :  { %v1603_v61 = vpop.f32.mrf.mxu1 }
  0xfc   :  { %v832_v62 = vpop.f32.mrf.mxu0 }
  0xfd   :  { %v888_v63 = vpop.f32.mrf.mxu1 }
  0xfe   :  { %v833_v0 = vpop.f32.mrf.mxu0 }
  0xff   :  { %v889_v1 = vpop.f32.mrf.mxu1  ;;  %v834_v44 = vadd.f32 %v833_v0, %v832_v62  ;;  %v825_v62 = vadd.f32 %v1593_v52, %v1587_v49  ;;  %v881_v49 = vadd.f32 %v1595_v53, %v1589_v50 }
 0x102   :  { %v835_v2 = vpop.f32.mrf.mxu0 }
 0x103   :  { %v891_v3 = vpop.f32.mrf.mxu1 }
 0x104   :  { %v836_v4 = vpop.f32.mrf.mxu0 }
 0x105   :  { %v892_v5 = vpop.f32.mrf.mxu1  ;;  %v837_v42 = vadd.f32 %v836_v4, %v835_v2 }
 0x108   :  { %v838_v6 = vpop.f32.mrf.mxu0 }
 0x109   :  { %v894_v7 = vpop.f32.mrf.mxu1 }
 0x10a   :  { %v839_v8 = vpop.f32.mrf.mxu0 }
 0x10b   :  { %v895_v9 = vpop.f32.mrf.mxu1  ;;  %v840_v48 = vadd.f32 %v839_v8, %v838_v6  ;;  %v190_v6 = vpop.permute.xlu0 %189 }
 0x10c   :  { %v896_v2 = vadd.f32 %v895_v9, %v894_v7  ;;  %v319_v52 = vadd.f32 %v825_v62, %v190_v6 }
 0x10e   :  { %v841_v10 = vpop.f32.mrf.mxu0 }
 0x10f   :  { %v897_v11 = vpop.f32.mrf.mxu1 }
 0x110   :  { %v842_v12 = vpop.f32.mrf.mxu0 }
 0x111   :  { %v898_v13 = vpop.f32.mrf.mxu1  ;;  %v843_v18 = vadd.f32 %v842_v12, %v841_v10  ;;  %v831_v12 = vadd.f32 %v830_v60, %v829_v58 }
 0x112   :  { %v899_v25 = vadd.f32 %v898_v13, %v897_v11  ;;  %v339_v13 = vadd.f32 %v837_v42, %v1581_v38  ;;  %v887_v38 = vadd.f32 %v1603_v61, %v1601_v59 }
 0x113   :  { %v349_v24 = vadd.f32 %v843_v18, %v220_v22  ;;  %v334_v18 = vadd.f32 %v834_v44, %v1583_v39  ;;  %v890_v22 = vadd.f32 %v889_v1, %v888_v63  ;;  %v329_v8 = vadd.f32 %v831_v12, %v200_v47 }
 0x114   :  { %v1605_v14 = vpop.f32.mrf.mxu0 }
 0x115   :  { %v953_v15 = vpop.f32.mrf.mxu1  ;;  %v454_v30 = vadd.f32 %v899_v25, %v349_v24  ;;  %v344_v25 = vadd.f32 %v840_v48, %v215_v33  ;;  %v439_v60 = vadd.f32 %v890_v22, %v334_v18  ;;  %v434_v9 = vadd.f32 %v887_v38, %v329_v8 }
 0x116   :  { %v1607_v16 = vpop.f32.mrf.mxu0 }
 0x117   :  { %v954_v17 = vpop.f32.mrf.mxu1  ;;  %v449_v1 = vadd.f32 %v896_v2, %v344_v25 }
 0x118   :  { %v955_v31 = vadd.f32 %v954_v17, %v953_v15  ;;  %v893_v15 = vadd.f32 %v892_v5, %v891_v3  ;;  %v828_v17 = vadd.f32 %v827_v56, %v826_v54  ;;  %v884_v56 = vadd.f32 %v1599_v57, %v1597_v55 }
 0x119   :  { %v1609_v19 = vpop.f32.mrf.mxu0  ;;  %v1611_v20 = vpop.f32.mrf.mxu1 }
 0x11a   :  { %v559_v41 = vadd.f32 %v955_v31, %v454_v30  ;;  %v444_v58 = vadd.f32 %v893_v15, %v339_v13  ;;  %v324_v39 = vadd.f32 %v828_v17, %v1585_v40 }
 0x11b   :  { %v936_v21 = vpop.f32.mrf.mxu0  ;;  %v1613_v23 = vpop.f32.mrf.mxu1 }
 0x11c   :  { %v429_v31 = vadd.f32 %v884_v56, %v324_v39  ;;  %v937_v40 = vadd.f32 %v936_v21, %v1609_v19 }
 0x11d   :  { %v938_v26 = vpop.f32.mrf.mxu0  ;;  %v1615_v27 = vpop.f32.mrf.mxu1 }
 0x11f   :  { %v939_v28 = vpop.f32.mrf.mxu0  ;;  %v1617_v29 = vpop.f32.mrf.mxu1 }
 0x120   :  { %v940_v30 = vadd.f32 %v939_v28, %v938_v26 }
 0x121   :  { %v941_v32 = vpop.f32.mrf.mxu0  ;;  %v988_v34 = vpop.f32.mrf.mxu1 }
 0x123   :  { %v942_v35 = vpop.f32.mrf.mxu0  ;;  %v648_v36 = vpop.f32.mrf.mxu1 }
 0x124   :  { %v943_v3 = vadd.f32 %v942_v35, %v941_v32  ;;  %v934_v32 = vadd.f32 %v1607_v16, %v1605_v14  ;;  %v534_v35 = vadd.f32 %v940_v30, %v429_v31 }
 0x125   :  { %v944_v37 = vpop.f32.mrf.mxu0  ;;  %v991_v43 = vpop.f32.mrf.mxu1 }
 0x126   :  { %v664_v45 = vadd.f32 %v991_v43, %v559_v41  ;;  %v424_v41 = vadd.f32 %v881_v49, %v319_v52  ;;  %v524_v28 = vadd.f32 %v934_v32, %v1591_v51  ;;  %v639_v19 = vadd.f32 %v1617_v29, %v534_v35  ;;  %v676_v51 = vld [vmem:[%s1652_s3 + $0x8] sm:$0xff] }
 0x127   :  { %v945_v46 = vpop.f32.mrf.mxu0  ;;  %v658_v33 = vpop.f32.mrf.mxu1 }
 0x128   :  { %v674_v10 = vmax.f32 %v664_v45, 0.0  ;;  %v946_v54 = vadd.f32 %v945_v46, %v944_v37  ;;  %v539_v37 = vadd.f32 %v943_v3, %v434_v9  ;;  %v529_v50 = vadd.f32 %v937_v40, %v424_v41  ;;  %v682_v45 = vpop.permute.xlu0 %681 }
 0x129   :  { %v947_v11 = vpop.f32.mrf.mxu0  ;;  %v629_v16 = vadd.f32 %v1613_v23, %v524_v28 }
 0x12a   :  { %992 = vmatprep.subr.mxu1 %v674_v10  ;;  %v544_v59 = vadd.f32 %v946_v54, %v439_v60  ;;  %v644_v26 = vadd.f32 %v1615_v27, %v539_v37  ;;  %v634_v14 = vadd.f32 %v1611_v20, %v529_v50  ;;  %v687_v20 = vpop.permute.xlu1 %686 }
 0x12b   :  { %v948_v24 = vpop.f32.mrf.mxu0  ;;  %993 = vmatpush3.msra.mxu1 %v674_v10  ;;  %v667_v44 = vmax.f32 %v629_v16, 0.0 }
 0x12c   :  { %v949_v4 = vadd.f32 %v948_v24, %v947_v11  ;;  %v649_v43 = vadd.f32 %v648_v36, %v544_v59  ;;  %v669_v36 = vmax.f32 %v639_v19, 0.0  ;;  %v668_v27 = vmax.f32 %v634_v14, 0.0 }
 0x12d   :  { %v950_v0 = vpop.f32.mrf.mxu0 }
 0x12e   :  { %v549_v5 = vadd.f32 %v949_v4, %v444_v58  ;;  %v671_v21 = vmax.f32 %v649_v43, 0.0 }
 0x12f   :  { %v951_v63 = vpop.f32.mrf.mxu0 }
 0x130   :  { %v952_v7 = vadd.f32 %v951_v63, %v950_v0  ;;  %v654_v57 = vadd.f32 %v988_v34, %v549_v5  ;;  %v670_v34 = vmax.f32 %v644_v26, 0.0 }
 0x132   :  { %v554_v61 = vadd.f32 %v952_v7, %v449_v1  ;;  %v672_v53 = vmax.f32 %v654_v57, 0.0 }
 0x134   :  { %v659_v55 = vadd.f32 %v658_v33, %v554_v61 }
 0x136   :  { %v673_v42 = vmax.f32 %v659_v55, 0.0 }
 0x138   :  { %994 = vmatprep.subr.mxu1 %v673_v42 }
 0x139   :  { %995 = vmatpush3.msra.mxu1 %v673_v42 }
 0x13a   :  { %996 = vmatprep.subr.mxu1 %v672_v53 }
 0x13b   :  { %997 = vmatpush3.msra.mxu1 %v672_v53 }
 0x13c   :  { %998 = vmatprep.subr.mxu1 %v671_v21 }
 0x13d   :  { %999 = vmatpush3.msra.mxu1 %v671_v21 }
 0x13e   :  { %1000 = vmatprep.subr.mxu1 %v670_v34 }
 0x13f   :  { %1001 = vmatpush3.msra.mxu1 %v670_v34 }
 0x140   :  { %1002 = vmatprep.subr.mxu1 %v669_v36 }
 0x141   :  { %1003 = vmatpush3.msra.mxu1 %v669_v36 }
 0x142   :  { %1004 = vmatprep.subr.mxu1 %v668_v27 }
 0x143   :  { %1005 = vmatpush3.msra.mxu1 %v668_v27 }
 0x144   :  { %1006 = vmatprep.subr.mxu1 %v667_v44 }
 0x145   :  { %1007 = vmatpush3.msra.mxu1 %v667_v44 }
 0x146   :  { %1009 = vmatmul.mubr.msk.f32.vlgmr.msra.gmra.mxu1 %vm689_vm1, %v676_v51 }
 0x206   :  { %v1010_v29 = vpop.f32.mrf.mxu1 }
 0x207   :  { %v768_v23 = vadd.f32 %v1010_v29, %v687_v20 }
 0x208   :  { %v762_v46 = vpop.f32.mrf.mxu1 }
 0x209   :  { %773 = vst.msk [vmem:[%s1653_s5 + $0x8] sm:$0xff] %vm771_vm2, %v768_v23  ;;  %v763_v47 = vadd.f32 %v762_v46, %v682_v45 }
 0x20b   :  { %772 = vst.msk [vmem:[%s1653_s5] sm:$0xff] %vm771_vm2, %v763_v47 }

</bundles_post_ra>
